<compile_context>
chip_gen: v7x
topology: tpu7x:2x2x1
jax: 0.10.0
libtpu: 0.0.40
codegen_flags: <defaults>
</compile_context>

<pallas_src>
import functools
import math

import jax
import jax.numpy as jnp
from jax import lax
from jax.experimental import pallas as pl
from jax.experimental.pallas import tpu as pltpu

# Above the scoped-VMEM defaults (16 MiB v5e / 32 MiB v6e,v7x), below v7x's 64 MiB physical.
_VMEM_LIMIT_BYTES = 48 * 1024 * 1024


# ---------------------------------------------------------------------------------------
# Projection kernels: out[b, s, :] = x[b, s, :] @ w (+ bias[s, :]) , tiled over (B, S, N).
# Used for (a) the fused K|V projection (bias = per-position rotary add on the K half) and
# (b) the output projection wO (no bias).
# ---------------------------------------------------------------------------------------
def _proj_bias_kernel(x_ref, w_ref, b_ref, o_ref):
    o_ref[0, :, :] = (
        jnp.dot(x_ref[0], w_ref[...], preferred_element_type=jnp.float32) + b_ref[...]
    ).astype(o_ref.dtype)


def _proj_kernel(x_ref, w_ref, o_ref):
    o_ref[0, :, :] = jnp.dot(
        x_ref[0], w_ref[...], preferred_element_type=jnp.float32
    ).astype(o_ref.dtype)


def _batched_proj(x, w, *, bias=None, out_dtype, seq_block=256, out_block=512):
    B, S, K = x.shape
    Kw, N = w.shape
    assert K == Kw
    ts = min(seq_block, S)
    to = min(out_block, N)
    assert S % ts == 0 and N % to == 0
    assert ts % 8 == 0 and to % 128 == 0

    in_specs = [
        pl.BlockSpec((1, ts, K), lambda b, si, oi: (b, si, 0)),   # activations tile
        pl.BlockSpec((K, to), lambda b, si, oi: (0, oi)),         # weight column block
    ]
    operands = [x, w]
    if bias is not None:
        in_specs.append(pl.BlockSpec((ts, to), lambda b, si, oi: (si, oi)))
        operands.append(bias)
        kernel = _proj_bias_kernel
    else:
        kernel = _proj_kernel

    return pl.pallas_call(
        kernel,
        out_shape=jax.ShapeDtypeStruct((B, S, N), out_dtype),
        grid_spec=pltpu.PrefetchScalarGridSpec(
            num_scalar_prefetch=0,
            grid=(B, S // ts, N // to),
            in_specs=in_specs,
            out_specs=pl.BlockSpec((1, ts, to), lambda b, si, oi: (b, si, oi)),
        ),
        compiler_params=pltpu.CompilerParams(
            dimension_semantics=("parallel", "parallel", "parallel"),
            vmem_limit_bytes=_VMEM_LIMIT_BYTES,
        ),
    )(*operands)


# ---------------------------------------------------------------------------------------
# Flash attention over precomputed K/V tiles.
# ---------------------------------------------------------------------------------------
def _flash_attn_kernel(qrow_ref, freq_q_ref, k_ref, v_ref, o_ref,
                       q_sc, m_sc, l_sc, acc_sc, *, tq, tkv, scale, mask_value):
    qi = pl.program_id(1)
    ki = pl.program_id(3)
    n_kv = pl.num_programs(3)

    # --- per (batch, q_tile, head): reset flash state and build the query tile -----------
    @pl.when(ki == 0)
    def _init():
        m_sc[...] = jnp.full(m_sc.shape, -jnp.inf, m_sc.dtype)
        l_sc[...] = jnp.zeros(l_sc.shape, l_sc.dtype)
        acc_sc[...] = jnp.zeros(acc_sc.shape, acc_sc.dtype)
        # One shared query row; the per-position "rotary" add broadcasts it to tq rows.
        q = (qrow_ref[0] + freq_q_ref[...]) * scale            # (tq, Hd) f32, scale folded in
        q_sc[...] = q.astype(q_sc.dtype)                       # bf16 for the MXU

    q_start = qi * tq
    k_start = ki * tkv
    # kv tile has at least one allowed (past/present) column for this q tile
    within_causal = k_start <= q_start + (tq - 1)
    # kv tile touches/extends past the diagonal of this q tile -> needs the causal mask
    needs_mask = (k_start + tkv - 1) > q_start

    def scores():
        # q @ k^T, contracting the head_dim axis of both (no transpose materialized).
        return lax.dot_general(q_sc[...], k_ref[0], (((1,), (1,)), ((), ())),
                               preferred_element_type=jnp.float32)      # (tq, tkv) f32

    def online_softmax_update(s):
        m_prev = m_sc[...]
        m_new = jnp.maximum(m_prev, jnp.max(s, axis=-1, keepdims=True))
        alpha = jnp.exp(m_prev - m_new)
        p = jnp.exp(s - m_new)                                          # f32 softmax math
        l_sc[...] = alpha * l_sc[...] + jnp.sum(p, axis=-1, keepdims=True)
        acc_sc[...] = alpha * acc_sc[...] + jnp.dot(
            p.astype(jnp.bfloat16), v_ref[0], preferred_element_type=jnp.float32)
        m_sc[...] = m_new

    # Tiles strictly below the diagonal: no mask ops at all.
    @pl.when(jnp.logical_and(within_causal, jnp.logical_not(needs_mask)))
    def _below_diag():
        online_softmax_update(scores())

    # Diagonal tiles: build the causal mask.
    @pl.when(jnp.logical_and(within_causal, needs_mask))
    def _on_diag():
        s = scores()
        row = q_start + lax.broadcasted_iota(jnp.int32, s.shape, 0)
        col = k_start + lax.broadcasted_iota(jnp.int32, s.shape, 1)
        online_softmax_update(jnp.where(row >= col, s, mask_value))

    # --- after the last kv step: normalize and write this head's output block once -------
    @pl.when(ki == n_kv - 1)
    def _finalize():
        o = acc_sc[...] * pl.reciprocal(l_sc[...], approx=True)         # (tq, Hd) f32
        o_ref[0, :, :] = o.astype(o_ref.dtype)                          # bf16 writeback


def _flash_attention(q_row, freq, kv, *, n_heads, head_dim, seq_len, q_block, kv_block):
    B = q_row.shape[0]
    S = seq_len
    tq = min(q_block, S)
    tkv = min(kv_block, S)
    assert S % tq == 0 and S % tkv == 0
    assert tq % 8 == 0 and tkv % 8 == 0 and head_dim % 128 == 0
    n_q, n_kv = S // tq, S // tkv
    HHd = n_heads * head_dim

    kernel = functools.partial(_flash_attn_kernel, tq=tq, tkv=tkv,
                               scale=1.0 / math.sqrt(head_dim), mask_value=-1e30)

    def kv_block_idx(qi, ki):
        # Clamp causally-skipped kv tiles to the last needed tile: identical block index
        # across skipped steps => Pallas does not re-DMA the tile for those steps.
        last_needed = (qi * tq + tq - 1) // tkv
        return jnp.minimum(ki, last_needed)

    return pl.pallas_call(
        kernel,
        out_shape=jax.ShapeDtypeStruct((B, S, HHd), jnp.bfloat16),
        grid_spec=pltpu.PrefetchScalarGridSpec(
            num_scalar_prefetch=0,
            grid=(B, n_q, n_heads, n_kv),
            in_specs=[
                # precomputed query row per (batch, head)
                pl.BlockSpec((1, 1, head_dim), lambda b, qi, h, ki: (b, 0, h)),
                # rotary add for the q rows of this q tile
                pl.BlockSpec((tq, head_dim), lambda b, qi, h, ki: (qi, 0)),
                # K tile for head h  (kv layout: [K_h0..K_h{H-1} | V_h0..V_h{H-1}])
                pl.BlockSpec((1, tkv, head_dim),
                             lambda b, qi, h, ki: (b, kv_block_idx(qi, ki), h)),
                # V tile for head h
                pl.BlockSpec((1, tkv, head_dim),
                             lambda b, qi, h, ki: (b, kv_block_idx(qi, ki), n_heads + h)),
            ],
            out_specs=pl.BlockSpec((1, tq, head_dim), lambda b, qi, h, ki: (b, qi, h)),
            scratch_shapes=[
                pltpu.VMEM((tq, head_dim), jnp.bfloat16),   # query tile (rotary-added, scaled)
                pltpu.VMEM((tq, 1), jnp.float32),           # running max
                pltpu.VMEM((tq, 1), jnp.float32),           # running denominator
                pltpu.VMEM((tq, head_dim), jnp.float32),    # running numerator
            ],
        ),
        compiler_params=pltpu.CompilerParams(
            dimension_semantics=("parallel", "parallel", "parallel", "arbitrary"),
            vmem_limit_bytes=_VMEM_LIMIT_BYTES,
        ),
    )(q_row, freq, kv, kv)   # same kv array read twice (K half / V half)


# ---------------------------------------------------------------------------------------
# Full module forward.
# ---------------------------------------------------------------------------------------
def selfattention_pallas(x, img, freq_interleaved, wq, wk, wv, wo, *,
                         n_heads, head_dim,
                         q_block=256, kv_block=256,        # use 128 on v5e (128-wide MXU)
                         proj_seq_block=256, proj_out_block=512):
    B, S, dim = x.shape
    HHd = n_heads * head_dim
    assert wq.shape == (dim, HHd) and wk.shape[0] == dim and wo.shape == (HHd, dim)
    bf16 = jnp.bfloat16
    freq32 = freq_interleaved.astype(jnp.float32)

    # 1) Query row: img @ wQ is an M=1 matvec -> precompute once in plain XLA and feed it
    #    to the attention kernel per (batch, head); keeps the hot loop MXU-dense.
    q_row = img.astype(jnp.float32) @ wq.astype(jnp.float32)            # (B, 1, H*Hd) f32

    # 2) Fused K|V projection with the "rotary" (complex add) folded in as a per-position
    #    additive bias on the K half.  Layout: [K_h0..K_h{H-1} | V_h0..V_h{H-1}].
    wkv = jnp.concatenate([wk, wv], axis=1).astype(bf16)                # (dim, 2*H*Hd)
    kv_bias = jnp.concatenate(
        [jnp.tile(freq32, (1, n_heads)), jnp.zeros((S, HHd), jnp.float32)], axis=1)
    kv = _batched_proj(x.astype(bf16), wkv, bias=kv_bias, out_dtype=bf16,
                       seq_block=proj_seq_block, out_block=proj_out_block)

    # 3) Flash attention over precomputed K/V tiles -> (B, S, H*Hd) bf16.
    o = _flash_attention(q_row, freq32, kv, n_heads=n_heads, head_dim=head_dim,
                         seq_len=S, q_block=q_block, kv_block=kv_block)

    # 4) Output projection wO: full-width contraction (H*Hd), f32 output like the module.
    return _batched_proj(o, wo.astype(bf16), bias=None, out_dtype=jnp.float32,
                         seq_block=proj_seq_block, out_block=proj_out_block)


# ---------------------------------------------------------------------------------------
# Pure-JAX reference (f32), matching the PyTorch forward (inference=False, nRep == 1).
# ---------------------------------------------------------------------------------------
def selfattention_reference(x, img, freq_interleaved, wq, wk, wv, wo,
                            *, n_heads, head_dim):
    B, S, dim = x.shape
    xq = jnp.broadcast_to(img @ wq, (B, S, n_heads * head_dim))
    xq = xq.reshape(B, S, n_heads, head_dim)
    xk = (x @ wk).reshape(B, S, n_heads, head_dim)
    xv = (x @ wv).reshape(B, S, n_heads, head_dim)
    xq = xq + freq_interleaved[None, :, None, :]
    xk = xk + freq_interleaved[None, :, None, :]
    q = xq.transpose(0, 2, 1, 3)
    k = xk.transpose(0, 2, 1, 3)
    v = xv.transpose(0, 2, 1, 3)
    s = jnp.einsum('bhqd,bhkd->bhqk', q, k) / math.sqrt(head_dim)
    mask = jnp.tril(jnp.ones((S, S), dtype=bool))
    s = jnp.where(mask, s, -jnp.inf)
    p = jax.nn.softmax(s, axis=-1)
    o = jnp.einsum('bhqk,bhkd->bhqd', p, v)
    o = o.transpose(0, 2, 1, 3).reshape(B, S, n_heads * head_dim)
    return o @ wo


if __name__ == "__main__":
    # Small but (8,128)-aligned shapes: head_dim=128 lanes, dim multiple of 128, S=512 so
    # the flash loop exercises the unmasked below-diagonal path, the masked diagonal path,
    # and a causally-skipped (clamped-DMA) tile.
    B, S = 2, 512
    n_heads = 2
    head_dim = 128
    dim = n_heads * head_dim             # 256
    n_kv_heads = n_heads                 # args.nKVHeads is None -> nHeads (nRep == 1)

    key = jax.random.PRNGKey(0)
    kx, kimg, kfr, kfi, kq, kk, kv_, ko = jax.random.split(key, 8)

    def bf16_round(a):
        # Pre-round to bf16 so the kernel's boundary cast is lossless and the f32 reference
        # sees identical inputs (isolates MXU bf16-accumulation error only).
        return a.astype(jnp.bfloat16).astype(jnp.float32)

    x = bf16_round(jax.random.normal(kx, (B, S, dim), dtype=jnp.float32))
    img = bf16_round(jax.random.normal(kimg, (B, 1, dim), dtype=jnp.float32))

    # FreqComplex: (S, head_dim//2) complex -> interleaved real (S, head_dim): [.,2i]=Re, [.,2i+1]=Im
    freq_re = jax.random.normal(kfr, (S, head_dim // 2), dtype=jnp.float32)
    freq_im = jax.random.normal(kfi, (S, head_dim // 2), dtype=jnp.float32)
    freq_interleaved = jnp.stack([freq_re, freq_im], axis=-1).reshape(S, head_dim)

    # nn.Linear(in, out, bias=False): weight is (out, in), y = x @ W.T; we build W.T (in, out).
    scale_init = 0.02
    wq = bf16_round(scale_init * jax.random.normal(kq, (dim, n_heads * head_dim), dtype=jnp.float32))
    wk = bf16_round(scale_init * jax.random.normal(kk, (dim, n_kv_heads * head_dim), dtype=jnp.float32))
    wv = bf16_round(scale_init * jax.random.normal(kv_, (dim, n_kv_heads * head_dim), dtype=jnp.float32))
    wo = bf16_round(scale_init * jax.random.normal(ko, (n_heads * head_dim, dim), dtype=jnp.float32))

    out = selfattention_pallas(x, img, freq_interleaved, wq, wk, wv, wo,
                               n_heads=n_heads, head_dim=head_dim)
    out = jax.block_until_ready(out)

    ref = selfattention_reference(x, img, freq_interleaved, wq, wk, wv, wo,
                                  n_heads=n_heads, head_dim=head_dim)
    assert out.shape == (B, S, dim)
    err = float(jnp.max(jnp.abs(out - ref)))
    assert jnp.allclose(out, ref, rtol=2e-2, atol=2e-2), f"max abs err {err}"

    print("KERNEL_OK")
</pallas_src>

<mosaic_0001>
module attributes {stable_mosaic.version = 11 : i64} {
  func.func @_proj_bias_kernel(%arg0: i32, %arg1: i32, %arg2: i32, %arg3: memref<1x256x256xbf16, #tpu.memory_space<vmem>>, %arg4: memref<256x512xbf16, #tpu.memory_space<vmem>>, %arg5: memref<256x512xf32, #tpu.memory_space<vmem>>, %arg6: memref<1x256x512xbf16, #tpu.memory_space<vmem>>) attributes {dimension_semantics = [#tpu.dimension_semantics<parallel>, #tpu.dimension_semantics<parallel>, #tpu.dimension_semantics<parallel>], iteration_bounds = array<i64: 2, 2, 1>, scalar_prefetch = 0 : i64, scratch_operands = 0 : i64, tpu.core_type = #tpu.core_type<tc>, window_params = [{transform_indices = @transform_0, window_bounds = array<i64: 1, 256, 256>}, {transform_indices = @transform_1, window_bounds = array<i64: 256, 512>}, {transform_indices = @transform_2, window_bounds = array<i64: 256, 512>}, {transform_indices = @transform_3, window_bounds = array<i64: 1, 256, 512>}]} {
    %c0 = arith.constant 0 : index
    %c0_0 = arith.constant 0 : index
    %c0_1 = arith.constant 0 : index
    %0 = vector.load %arg3[%c0, %c0_0, %c0_1] : memref<1x256x256xbf16, #tpu.memory_space<vmem>>, vector<1x256x256xbf16>
    %1 = vector.shape_cast %0 : vector<1x256x256xbf16> to vector<256x256xbf16>
    %c0_2 = arith.constant 0 : index
    %c0_3 = arith.constant 0 : index
    %2 = vector.load %arg4[%c0_2, %c0_3] : memref<256x512xbf16, #tpu.memory_space<vmem>>, vector<256x512xbf16>
    %cst = arith.constant dense<0.000000e+00> : vector<256x512xf32>
    %3 = tpu.matmul %1, %2, %cst {dimension_numbers = #tpu.dot_dimension_numbers<[1], [0], [0], [1], [0, 0, 1, 1], [], []>} : vector<256x256xbf16>, vector<256x512xbf16>, vector<256x512xf32> -> vector<256x512xf32>
    %c0_4 = arith.constant 0 : index
    %c0_5 = arith.constant 0 : index
    %4 = vector.load %arg5[%c0_4, %c0_5] : memref<256x512xf32, #tpu.memory_space<vmem>>, vector<256x512xf32>
    %5 = arith.addf %3, %4 : vector<256x512xf32>
    %6 = arith.truncf %5 : vector<256x512xf32> to vector<256x512xbf16>
    %c0_6 = arith.constant 0 : index
    %c0_7 = arith.constant 0 : index
    %c0_8 = arith.constant 0 : index
    %7 = vector.load %arg6[%c0_6, %c0_7, %c0_8] : memref<1x256x512xbf16, #tpu.memory_space<vmem>>, vector<1x256x512xbf16>
    %8 = vector.shape_cast %7 : vector<1x256x512xbf16> to vector<256x512xbf16>
    %9 = vector.shape_cast %6 : vector<256x512xbf16> to vector<1x256x512xbf16>
    tpu.vector_store %arg6[%c0_6, %c0_7, %c0_8], %9 {strides = array<i32>} : memref<1x256x512xbf16, #tpu.memory_space<vmem>>, vector<1x256x512xbf16>,
    return
  }
  func.func @transform_0(%arg0: i32, %arg1: i32, %arg2: i32) -> (i32, i32, i32) {
    %c0_i32 = arith.constant 0 : i32
    %c0_i32_0 = arith.constant 0 : i32
    return %arg0, %arg1, %c0_i32 : i32, i32, i32
  }
  func.func @transform_1(%arg0: i32, %arg1: i32, %arg2: i32) -> (i32, i32) {
    %c0_i32 = arith.constant 0 : i32
    %c0_i32_0 = arith.constant 0 : i32
    return %c0_i32, %arg2 : i32, i32
  }
  func.func @transform_2(%arg0: i32, %arg1: i32, %arg2: i32) -> (i32, i32) {
    %c0_i32 = arith.constant 0 : i32
    return %arg1, %arg2 : i32, i32
  }
  func.func @transform_3(%arg0: i32, %arg1: i32, %arg2: i32) -> (i32, i32, i32) {
    %c0_i32 = arith.constant 0 : i32
    return %arg0, %arg1, %arg2 : i32, i32, i32
  }
}

</mosaic_0001>

<bundles_post_ra>
// kernel: tpu_custom_call.1
= control target key start
LH: loop header
LB: loop body
LE: loop exit
PB: predicated region body
PF: predicated region fallthrough
CT: control target
= control target key end

     0   :  { %s3331_s0 = inlined_call_operand.hbm [shape: bf16[2,512,256], index: 0, kind: input, shape index: {}]   ;;  %s3332_s1 = inlined_call_operand.hbm [shape: bf16[256,512], index: 1, kind: input, shape index: {}]   ;;  %s3333_s2 = inlined_call_operand.hbm [shape: f32[512,512], index: 2, kind: input, shape index: {}]   ;;  %s3334_s3 = inlined_call_operand.hbm [shape: bf16[2,512,512], index: 3, kind: output, shape index: {}]  }
   0x1   :  { %3347 = sst [smem:[#allocation20_spill]] %s3331_s0 }
   0x2   :  { %3348 = sst [smem:[#allocation21_spill]] %s3334_s3 }
   0x3   :  { %8 = vsyncpa [#allocation3], 0 }
   0x4   :  { %10 = vsyncpa [#allocation3 + $0x1], 0 }
   0x5   :  { %11 = vsyncpa [#allocation6], 0 }
   0x6   :  { %12 = vsyncpa [#allocation4], 0 }
   0x7   :  { %14 = vsyncpa [#allocation4 + $0x1], 0  ;;  %s2751_s12 = smov 0   ;;  %s2753_s13 = smov 0  }
   0x8   :  { %s2755_s14 = smov 0   ;;  %s2757_s15 = smov 0  }
   0x9   :  { %s2759_s16 = smov 0   ;;  %s2761_s17 = smov 0  }
   0xa   :  { %s2763_s18 = smov 0   ;;  %s2765_s19 = smov 0  }
   0xb   :  { %s2767_s20 = smov 0   ;;  %s2769_s21 = smov 0  }
   0xc   :  { %s2771_s22 = smov 0  }
   0xd LB: > { %3349 = sst [smem:[#allocation13_spill]] %s2701_s18  ;;  %s35_s23 = sadd.s32 1, %s2709_s20  ;;  %s2717_s22 = sphi %s2771_s22, %s20_s22   ;;  %s2713_s21 = sphi %s2769_s21, %s3391_s21   ;;  %s2709_s20 = sphi %s2767_s20, %s3383_s20   ;;  %s2705_s19 = sphi %s2765_s19, %s3382_s19   ;;  %s2701_s18 = sphi %s2763_s18, %s3381_s18   ;;  %s2697_s17 = sphi %s2761_s17, %s3390_s17   ;;  %s2693_s16 = sphi %s2759_s16, %s3389_s16   ;;  %s2689_s15 = sphi %s2757_s15, %s3388_s15   ;;  %s2685_s14 = sphi %s2755_s14, %s3387_s14   ;;  %s2681_s13 = sphi %s2753_s13, %s3386_s13   ;;  %s2677_s12 = sphi %s2751_s12, %s3385_s12  }
   0xe   : > { %3350 = sst [smem:[#allocation14_spill]] %s2705_s19  ;;  %s39_s24 = sadd.s32 1, %s2713_s21 }
   0xf   : > { %3351 = sst [smem:[#allocation15_spill]] %s2709_s20  ;;  %p37_p0 = scmp.ge.s32.totalorder %s35_s23, 2 }
  0x10   : > { %3352 = sst [smem:[#allocation16_spill]] %s2713_s21  ;;  %s48_s25 = sadd.s32 1, %s2697_s17 }
  0x11   : > { %p55_p1 = scmp.ne.s32.totalorder %s2697_s17, %s2693_s16  ;;  %p3338_p2 = scmp.eq.s32.totalorder %s2717_s22, 0 }
  0x12   : > { %s3393_s23 = smov (%p37_p0, %s35_s23), 0  ;;  %s3395_s24 = smov (!%p37_p0, %s39_s24), %s2713_s21 }
  0x13   : > { %3353 = sst [smem:[#allocation17_spill]] %s3393_s23  ;;  %s2817_s26 = ssub.s32 %s2709_s20, %s3393_s23 }
  0x14   : > { %p2824_p3 = por %p3338_p2, %p55_p1  ;;  %p41_p4 = scmp.ge.s32.totalorder %s3395_s24, 2 }
  0x15   : > { %p3337_p6 = scmp.lt.s32.totalorder %s2717_s22, 4  ;;  %s185_s28 = sand.u32 1, %s2717_s22  }
  0x16   : > { %s3397_s24 = smov (%p41_p4, %s3395_s24), 0  ;;  %s187_s29 = sand.u32 1, %s2697_s17  }
  0x17   : > { %3355 = sst [smem:[#allocation18_spill]] %s3397_s24  ;;  %s43_s30 = ssub.s32 %s2713_s21, %s3397_s24 }
  0x18   : > { %s45_s4 = sor.u32 %s2817_s26, %s43_s30  ;;  %s1980_s5 = sshll.u32 %s187_s29, 8 }
  0x19   : > { %p46_p7 = scmp.eq.s32.totalorder %s45_s4, 0  ;;  %s2161_s6 = sshll.u32 %s2709_s20, 6 }
  0x1a   : > { %s1983_s7 = sshll.u32 %s2713_s21, 7  ;;  %s189_s10 = scalar_lea.vmem [#allocation2], %s1980_s5 }
  0x1b   : > { %s2840_s8 = scalar_select %p46_p7, %s2697_s17, %s48_s25  }
  0x1c   : > { %s196_s9 = sadd.s32 %s2161_s6, %s1983_s7  ;;  %s199_s11 = sshll.u32 %s189_s10, 4  ;;  %s2842_s11 = int_to_ptr.vmem [resolvable:$true] %s199_s11 }
  0x1d   : > { %3356 = sst [smem:[#allocation19_spill]] %s2840_s8  ;;  %s1984_s23 = sshll.u32 %s196_s9, 6 }
  0x1e   : > { %s3357_s0 = sld [smem:[#allocation20_spill]]  ;;  %p2853_p8 = pnand %p3337_p6, %p2824_p3 }
  0x1f   : > { %s2857_s29 = scalar_lea.sflag [#allocation3], %s185_s28 }
  0x20   : > { %p2501_p10 = pneg %p2853_p8 }
  0x24   : > { %s2847_s18 = scalar_lea.hbm %s3357_s0, %s1984_s23  ;;  %s2504_s23 = scalar_lea.hbm %s3357_s0, 16384 }
  0x25   : > { %s2499_s30 = scalar_lea.hbm %s2847_s18, 4096  ;;  %p2505_p13 = scmp.lt.u32.totalorder %s2847_s18, %s3357_s0 }
  0x26   : > { %p2500_p9 = scmp.ne.s32.totalorder %s2847_s18, %s2499_s30  ;;  %p2506_p0 = scmp.lt.u32.totalorder %s2504_s23, %s2499_s30 }
  0x27   : > { %p2508_p4 = scmp.lt.u32.totalorder %s2499_s30, %s2847_s18 }
  0x28   : > { %p2502_p11 = pnand %p2501_p10, %p2500_p9  ;;  %p2507_p3 = por %p2506_p0, %p2505_p13 }
  0x2a   : > { %p2503_p12 = pneg %p2502_p11  ;;  %p2509_p7 = por %p2508_p4, %p2507_p3 }
  0x2c   : > { %p2510_p6 = pnand %p2509_p7, %p2503_p12 }
  0x2e   : > { %2513 = shalt.err (!%p2510_p6)
}
  0x2f   : > { %s2514_s28 = scalar_lea.vmem %s2842_s11, 4096  ;;  %s2719_s5 = smov [#allocation2]  }
  0x30   : > { %p2515_p9 = scmp.ne.s32.totalorder %s2842_s11, %s2514_s28  ;;  %s2519_s6 = sshll.u32 %s2719_s5, 4  ;;  %s2520_s6 = int_to_ptr.vmem [resolvable:$false] %s2519_s6 }
  0x31   : > { %s2521_s7 = scalar_lea.vmem %s2520_s6, 8192  ;;  %p2522_p5 = scmp.lt.s32.totalorder %s2842_s11, %s2520_s6 }
  0x32   : > { %p2517_p11 = pnand %p2515_p9, %p2501_p10  ;;  %p2523_p13 = scmp.lt.s32.totalorder %s2521_s7, %s2514_s28 }
  0x34   : > { %p2518_p2 = pneg %p2517_p11  ;;  %p2524_p0 = por %p2523_p13, %p2522_p5 }
  0x36   : > { %p2525_p3 = pnand %p2524_p0, %p2518_p2 }
  0x38   : > { %2528 = shalt.err (!%p2525_p3)
}
  0x39   : > { %s2720_s9 = smov 128   ;;  %s2721_s10 = smov 8  }
  0x3a   : > { %2246 = dma.hbm_to_vmem [thread:$0]  (!%p2853_p8), %s2847_s18, 4096, %s2842_s11, %s2857_s29, %s2720_s9, %s2720_s9, %s2721_s10  }
  0x3b   : > { %s2886_s30 = sadd.s32 4294967295, %s2717_s22   ;;  %s1976_s3 = sadd.s32 4294967294, %s2717_s22  }
  0x3c   : > { %p61_p2 = scmp.ne.s32.totalorder %s2693_s16, %s2689_s15  ;;  %p3341_p5 = scmp.eq.s32.totalorder %s2886_s30, 0 }
  0x3d   : > { %p115_p6 = scmp.ne.s32.totalorder %s2681_s13, %s2677_s12  ;;  %p143_p10 = scmp.eq.s32.totalorder %s2886_s30, 3 }
  0x3e   : > { %p149_p12 = scmp.eq.s32.totalorder %s1976_s3, 3  ;;  %p2897_p8 = por %p3341_p5, %p61_p2 }
  0x3f   : > { %p2903_p4 = por %p115_p6, %p3341_p5  ;;  %p2910_p7 = por %p143_p10, %p55_p1 }
  0x40   : > { %s3359_s18 = scalar_select %p2897_p8, 1, 0 }
  0x41   : > { %s3360_s11 = scalar_select %p2903_p4, 1, 0 }
  0x42   : > { %s3361_s25 = scalar_select %p2910_p7, 1, 0 }
  0x43   : > { %p2914_p9 = por %p149_p12, %p61_p2  ;;  %p1977_p11 = scmp.ge.s32.totalorder %s2717_s22, 1 }
  0x44   : > { %p156_p13 = scmp.lt.s32.totalorder %s2717_s22, 5  ;;  %s2722_s23 = smov [#allocation5]  }
  0x45   : > { %s3362_s12 = scalar_select %p2914_p9, 1, 0 }
  0x46   : > { %p2920_p0 = pnand %p1977_p11, %p156_p13  ;;  %s171_s27 = sshll.u32 %s2722_s23, 4  ;;  %s2924_s27 = int_to_ptr.vmem [resolvable:$true] %s171_s27 }
  0x47   : > { %s2163_s4 = sshll.u32 %s2709_s20, 14  ;;  %s102_s5 = sadd.s32 1, %s2685_s14 }
  0x48   : > { %s3363_s19 = scalar_select %p2920_p0, 1, 0 }
  0x49   : > { %p2239_p1 = pneg %p2920_p0  ;;  %s211_s6 = sand.u32 1, %s2685_s14  }
  0x4a   : > { %s2529_s10 = scalar_lea.hbm %s3332_s1, 8192 }
  0x4b   : > { %p2931_p3 = pnand %p2239_p1, %p3341_p5  ;;  %p2530_p6 = scmp.ne.s32.totalorder %s3332_s1, %s2529_s10 }
  0x4c   : > { %p2536_p13 = scmp.lt.u32.totalorder %s2529_s10, %s3332_s1 }
  0x4d   : > { %p2531_p10 = pneg %p2931_p3 }
  0x4f   : > { %p2532_p12 = pnand %p2531_p10, %p2530_p6 }
  0x51   : > { %p2533_p11 = pneg %p2532_p12 }
  0x53   : > { %p2538_p1 = pnand %p2536_p13, %p2533_p11 }
  0x55   : > { %2541 = shalt.err (!%p2538_p1)
}
  0x56   : > { %s2542_s21 = scalar_lea.vmem %s2924_s27, 8192  ;;  %p2550_p7 = scmp.lt.s32.totalorder %s2924_s27, %s2924_s27 }
  0x57   : > { %p2543_p5 = scmp.ne.s32.totalorder %s2924_s27, %s2542_s21  ;;  %p2551_p4 = scmp.lt.s32.totalorder %s2542_s21, %s2542_s21 }
  0x59   : > { %p2545_p2 = pnand %p2543_p5, %p2531_p10  ;;  %p2552_p8 = por %p2551_p4, %p2550_p7 }
  0x5b   : > { %p2546_p9 = pneg %p2545_p2 }
  0x5d   : > { %p2553_p0 = pnand %p2552_p8, %p2546_p9 }
  0x5f   : > { %2556 = shalt.err (!%p2553_p0)
}
  0x60   : > { %s2723_s7 = smov 256   ;;  %s2724_s0 = smov 16  }
  0x61   : > { %2242 = dma.hbm_to_vmem [thread:$0]  (!%p2931_p3), %s3332_s1, 8192, %s2924_s27, [#allocation6], %s2723_s7, %s2723_s7, %s2724_s0  }
  0x62   : > { %p3365_p5 = scmp.eq.s32.totalorder %s2817_s26, 0  ;;  %p3366_p8 = scmp.eq.s32.totalorder %s2717_s22, 0 }
  0x63   : > { %p3367_p4 = scmp.ne.s32.totalorder %s2685_s14, %s2681_s13  ;;  %s1985_s10 = sshll.u32 %s211_s6, 10 }
  0x64   : > { %s2963_s21 = scalar_select %p3365_p5, %s2685_s14, %s102_s5  }
  0x65   : > { %p111_p7 = por %p3367_p4, %p3366_p8  ;;  %s2973_s20 = scalar_lea.hbm %s3333_s2, %s2163_s4 }
  0x66   : > { %s213_s28 = scalar_lea.vmem [#allocation7], %s1985_s10  ;;  %p3368_p9 = scmp.lt.s32.totalorder %s2717_s22, 4 }
  0x67   : > { %s223_s8 = sshll.u32 %s213_s28, 4  ;;  %s2557_s27 = scalar_lea.hbm %s2973_s20, 16384  ;;  %s2981_s8 = int_to_ptr.vmem [resolvable:$true] %s223_s8 }
  0x68   : > { %p2977_p0 = pnand %p3368_p9, %p111_p7  ;;  %p2558_p3 = scmp.ne.s32.totalorder %s2973_s20, %s2557_s27 }
  0x69   : > { %s2562_s6 = scalar_lea.hbm %s3333_s2, 32768  ;;  %p2563_p12 = scmp.lt.u32.totalorder %s2973_s20, %s3333_s2 }
  0x6a   : > { %p2559_p2 = pneg %p2977_p0  ;;  %p2564_p11 = scmp.lt.u32.totalorder %s2562_s6, %s2557_s27 }
  0x6b   : > { %p2566_p1 = scmp.lt.u32.totalorder %s2557_s27, %s2973_s20 }
  0x6c   : > { %p2560_p6 = pnand %p2559_p2, %p2558_p3  ;;  %p2565_p13 = por %p2564_p11, %p2563_p12 }
  0x6e   : > { %p2561_p10 = pneg %p2560_p6  ;;  %p2567_p5 = por %p2566_p1, %p2565_p13 }
  0x70   : > { %p2568_p8 = pnand %p2567_p5, %p2561_p10 }
  0x72   : > { %2571 = shalt.err (!%p2568_p8)
}
  0x73   : > { %s2572_s24 = scalar_lea.vmem %s2981_s8, 16384  ;;  %s2725_s9 = smov [#allocation7]  }
  0x74   : > { %p2573_p4 = scmp.ne.s32.totalorder %s2981_s8, %s2572_s24  ;;  %s2577_s10 = sshll.u32 %s2725_s9, 4  ;;  %s2578_s10 = int_to_ptr.vmem [resolvable:$false] %s2577_s10 }
  0x75   : > { %s2579_s3 = scalar_lea.vmem %s2578_s10, 32768  ;;  %p2580_p3 = scmp.lt.s32.totalorder %s2981_s8, %s2578_s10 }
  0x76   : > { %p2575_p7 = pnand %p2573_p4, %p2559_p2  ;;  %p2581_p6 = scmp.lt.s32.totalorder %s2579_s3, %s2572_s24 }
  0x78   : > { %p2576_p9 = pneg %p2575_p7  ;;  %p2582_p12 = por %p2581_p6, %p2580_p3 }
  0x7a   : > { %p2583_p11 = pnand %p2582_p12, %p2576_p9 }
  0x7c   : > { %2586 = shalt.err (!%p2583_p11)
}
  0x7d   : > { %s2726_s23 = smov 512   ;;  %s2727_s28 = smov 32  }
  0x7e   : > { %2249 = dma.hbm_to_vmem [thread:$0]  (!%p2977_p0), %s2973_s20, 16384, %s2981_s8, %s2857_s29, %s2726_s23, %s2726_s23, %s2727_s28  }
  0x7f   : > { %p3370_p2 = scmp.ne.s32.totalorder %s3363_s19, 0 }
  0x80   : > { %s237_s27 = sand.u32 (!%p3370_p2), 1, %s2886_s30   ;;  %s3013_s4 = sand.u32 (!%p3370_p2), 1, %s2693_s16  }
  0x81   : > { %235 = sbr.rel (%p3370_p2) target bundleno = 563 (0x233), region = 32  ;;  %s1990_s5 = sshll.u32 (!%p3370_p2), %s3013_s4, 8 }
  0x82   : > { %s238_s6 = scalar_lea.sflag (!%p3370_p2), [#allocation3], %s237_s27  ;;  %s3016_s7 = scalar_lea.vmem (!%p3370_p2), [#allocation2], %s1990_s5 }
  0x83   : > { %p3371_p10 = scmp.ne.s32.totalorder (!%p3370_p2), %s3359_s18, 0 }
  0x88   : > { %2660 = dma.done.wait (%p3371_p10), %s238_s6, 4096  }
  0x89   : > { %2662 = vsyncadd (%p3371_p10), %s238_s6, 4294963200  ;;  %p3372_p0 = scmp.eq.s32.totalorder %s2886_s30, 0 }
  0x8b   : > { %2664 = dma.done.wait (%p3372_p0), [#allocation6], 8192   ;;  %p3373_p13 = pmov %p3372_p0 }
  0x8c   : > { %s252_s20 = sand.u32 1, %s2681_s13   ;;  %p3374_p1 = scmp.ne.s32.totalorder %s3360_s11, 0 }
  0x8d   : > { %2666 = vsyncadd (%p3373_p13), [#allocation6], 4294959104  ;;  %s1992_s8 = sshll.u32 %s252_s20, 10 }
  0x8e   : > { %s3027_s29 = scalar_lea.vmem [#allocation7], %s1992_s8 }
  0x8f   : > { %2668 = dma.done.wait (%p3374_p1), %s238_s6, 16384  }
  0x90   : > { %2670 = vsyncadd (%p3374_p1), %s238_s6, 4294950912  ;;  %v2355_v0 = vld [vmem:[#allocation5 + $0x4] ss:$16 sps:$4 sm:$0xff]   ;;  %v2357_v1 = vld [vmem:[#allocation5 + $0xc] ss:$16 sps:$4 sm:$0xff]   ;;  %s1993_s30 = sshll.u32 %s3013_s4, 9 }
  0x91   : > { %992 = vmatprep.subr.bf16.mxu0 %v2355_v0  ;;  %v2359_v2 = vld [vmem:[#allocation5] ss:$16 sps:$4 sm:$0xff]   ;;  %v2360_v3 = vld [vmem:[#allocation5 + $0x8] ss:$16 sps:$4 sm:$0xff]   ;;  %1185 = vmatprep.subr.bf16.mxu1 %v2357_v1  ;;  %v2361_v4 = vld [vmem:[#allocation5 + $0x24] ss:$16 sps:$4 sm:$0xff]  }
  0x92   : > { %993 = vmatpush1.bf16.msra.mxu0 %v2359_v2  ;;  %1186 = vmatpush1.bf16.msra.mxu1 %v2360_v3  ;;  %v2363_v5 = vld [vmem:[#allocation5 + $0x2c] ss:$16 sps:$4 sm:$0xff]   ;;  %v2365_v6 = vld [vmem:[#allocation5 + $0x20] ss:$16 sps:$4 sm:$0xff]   ;;  %v2366_v7 = vld [vmem:[#allocation5 + $0x28] ss:$16 sps:$4 sm:$0xff]  }
  0x93   : > { %994 = vmatprep.subr.bf16.mxu0 %v2361_v4  ;;  %1187 = vmatprep.subr.bf16.mxu1 %v2363_v5  ;;  %v2367_v8 = vld [vmem:[#allocation5 + $0x44] ss:$16 sps:$4 sm:$0xff]   ;;  %v2369_v9 = vld [vmem:[#allocation5 + $0x4c] ss:$16 sps:$4 sm:$0xff]   ;;  %v2371_v10 = vld [vmem:[#allocation5 + $0x40] ss:$16 sps:$4 sm:$0xff]  }
  0x94   : > { %v2372_v11 = vld [vmem:[#allocation5 + $0x48] ss:$16 sps:$4 sm:$0xff]   ;;  %v2373_v12 = vld [vmem:[#allocation5 + $0x64] ss:$16 sps:$4 sm:$0xff]   ;;  %v2375_v13 = vld [vmem:[#allocation5 + $0x6c] ss:$16 sps:$4 sm:$0xff]  }
  0x95   : > { %v2377_v14 = vld [vmem:[#allocation5 + $0x60] ss:$16 sps:$4 sm:$0xff]   ;;  %v2378_v15 = vld [vmem:[#allocation5 + $0x68] ss:$16 sps:$4 sm:$0xff]   ;;  %v2379_v16 = vld [vmem:[#allocation5 + $0x84] ss:$16 sps:$4 sm:$0xff]  }
  0x96   : > { %995 = vmatpush1.bf16.msra.mxu0 %v2365_v6  ;;  %1188 = vmatpush1.bf16.msra.mxu1 %v2366_v7  ;;  %v2381_v17 = vld [vmem:[#allocation5 + $0x8c] ss:$16 sps:$4 sm:$0xff]   ;;  %v2383_v18 = vld [vmem:[#allocation5 + $0x80] ss:$16 sps:$4 sm:$0xff]   ;;  %v2384_v19 = vld [vmem:[#allocation5 + $0x88] ss:$16 sps:$4 sm:$0xff]  }
  0x97   : > { %996 = vmatprep.subr.bf16.mxu0 %v2367_v8  ;;  %1189 = vmatprep.subr.bf16.mxu1 %v2369_v9  ;;  %v2385_v20 = vld [vmem:[#allocation5 + $0xa4] ss:$16 sps:$4 sm:$0xff]   ;;  %v2387_v21 = vld [vmem:[#allocation5 + $0xac] ss:$16 sps:$4 sm:$0xff]   ;;  %v2389_v22 = vld [vmem:[#allocation5 + $0xa0] ss:$16 sps:$4 sm:$0xff]  }
  0x98   : > { %v2390_v23 = vld [vmem:[#allocation5 + $0xa8] ss:$16 sps:$4 sm:$0xff]   ;;  %v2391_v24 = vld [vmem:[#allocation5 + $0xc4] ss:$16 sps:$4 sm:$0xff]   ;;  %v2393_v25 = vld [vmem:[#allocation5 + $0xcc] ss:$16 sps:$4 sm:$0xff]  }
  0x99   : > { %v2395_v26 = vld [vmem:[#allocation5 + $0xc0] ss:$16 sps:$4 sm:$0xff]   ;;  %v2396_v27 = vld [vmem:[#allocation5 + $0xc8] ss:$16 sps:$4 sm:$0xff]   ;;  %v2397_v28 = vld [vmem:[#allocation5 + $0xe4] ss:$16 sps:$4 sm:$0xff]  }
  0x9a   : > { %997 = vmatpush1.bf16.msra.mxu0 %v2371_v10  ;;  %1190 = vmatpush1.bf16.msra.mxu1 %v2372_v11  ;;  %v2399_v29 = vld [vmem:[#allocation5 + $0xec] ss:$16 sps:$4 sm:$0xff]   ;;  %v2401_v30 = vld [vmem:[#allocation5 + $0xe0] ss:$16 sps:$4 sm:$0xff]   ;;  %v2402_v31 = vld [vmem:[#allocation5 + $0xe8] ss:$16 sps:$4 sm:$0xff]  }
  0x9b   : > { %998 = vmatprep.subr.bf16.mxu0 %v2373_v12  ;;  %1191 = vmatprep.subr.bf16.mxu1 %v2375_v13  ;;  %v2403_v32 = vld [vmem:[#allocation5 + $0x104] ss:$16 sps:$4 sm:$0xff]   ;;  %v2405_v33 = vld [vmem:[#allocation5 + $0x10c] ss:$16 sps:$4 sm:$0xff]   ;;  %v2407_v34 = vld [vmem:[#allocation5 + $0x100] ss:$16 sps:$4 sm:$0xff]  }
  0x9c   : > { %v2408_v35 = vld [vmem:[#allocation5 + $0x108] ss:$16 sps:$4 sm:$0xff]   ;;  %v2409_v36 = vld [vmem:[#allocation5 + $0x124] ss:$16 sps:$4 sm:$0xff]   ;;  %v2411_v37 = vld [vmem:[#allocation5 + $0x12c] ss:$16 sps:$4 sm:$0xff]  }
  0x9d   : > { %v2413_v38 = vld [vmem:[#allocation5 + $0x120] ss:$16 sps:$4 sm:$0xff]   ;;  %v2414_v39 = vld [vmem:[#allocation5 + $0x128] ss:$16 sps:$4 sm:$0xff]   ;;  %v2415_v40 = vld [vmem:[#allocation5 + $0x144] ss:$16 sps:$4 sm:$0xff]  }
  0x9e   : > { %999 = vmatpush1.bf16.msra.mxu0 %v2377_v14  ;;  %1192 = vmatpush1.bf16.msra.mxu1 %v2378_v15  ;;  %v2417_v41 = vld [vmem:[#allocation5 + $0x14c] ss:$16 sps:$4 sm:$0xff]   ;;  %v2419_v42 = vld [vmem:[#allocation5 + $0x140] ss:$16 sps:$4 sm:$0xff]   ;;  %v2420_v43 = vld [vmem:[#allocation5 + $0x148] ss:$16 sps:$4 sm:$0xff]  }
  0x9f   : > { %1000 = vmatprep.subr.bf16.mxu0 %v2379_v16  ;;  %1193 = vmatprep.subr.bf16.mxu1 %v2381_v17  ;;  %v2421_v44 = vld [vmem:[#allocation5 + $0x164] ss:$16 sps:$4 sm:$0xff]   ;;  %v2423_v45 = vld [vmem:[#allocation5 + $0x16c] ss:$16 sps:$4 sm:$0xff]   ;;  %v2425_v46 = vld [vmem:[#allocation5 + $0x160] ss:$16 sps:$4 sm:$0xff]  }
  0xa0   : > { %v2426_v47 = vld [vmem:[#allocation5 + $0x168] ss:$16 sps:$4 sm:$0xff]   ;;  %v2453_v48 = vld [vmem:[%s3016_s7 + $0x4] ss:$8 sps:$4 sm:$0xff]   ;;  %v2431_v51 = vld [vmem:[#allocation5 + $0x180] ss:$16 sps:$4 sm:$0xff]  }
  0xa1   : > { %v2427_v49 = vld [vmem:[#allocation5 + $0x184] ss:$16 sps:$4 sm:$0xff]   ;;  %v2429_v50 = vld [vmem:[#allocation5 + $0x18c] ss:$16 sps:$4 sm:$0xff]   ;;  %1024 = vmatprep.mubr.bf16.mxu0 %v2453_v48  ;;  %1217 = vmatprep.mubr.bf16.mxu1 %v2453_v48  ;;  %v2432_v52 = vld [vmem:[#allocation5 + $0x188] ss:$16 sps:$4 sm:$0xff]  }
  0xa2   : > { %1001 = vmatpush1.bf16.msra.mxu0 %v2383_v18  ;;  %1194 = vmatpush1.bf16.msra.mxu1 %v2384_v19  ;;  %v2433_v53 = vld [vmem:[#allocation5 + $0x1a4] ss:$16 sps:$4 sm:$0xff]   ;;  %v2435_v54 = vld [vmem:[#allocation5 + $0x1ac] ss:$16 sps:$4 sm:$0xff]   ;;  %v2437_v55 = vld [vmem:[#allocation5 + $0x1a0] ss:$16 sps:$4 sm:$0xff]  }
  0xa3   : > { %1002 = vmatprep.subr.bf16.mxu0 %v2385_v20  ;;  %1195 = vmatprep.subr.bf16.mxu1 %v2387_v21  ;;  %v2438_v56 = vld [vmem:[#allocation5 + $0x1a8] ss:$16 sps:$4 sm:$0xff]   ;;  %v2439_v57 = vld [vmem:[#allocation5 + $0x1c4] ss:$16 sps:$4 sm:$0xff]   ;;  %v2441_v58 = vld [vmem:[#allocation5 + $0x1cc] ss:$16 sps:$4 sm:$0xff]  }
  0xa4   : > { %v2443_v59 = vld [vmem:[#allocation5 + $0x1c0] ss:$16 sps:$4 sm:$0xff]   ;;  %v2444_v60 = vld [vmem:[#allocation5 + $0x1c8] ss:$16 sps:$4 sm:$0xff]   ;;  %v2445_v61 = vld [vmem:[#allocation5 + $0x1e4] ss:$16 sps:$4 sm:$0xff]  }
  0xa5   : > { %v2447_v62 = vld [vmem:[#allocation5 + $0x1ec] ss:$16 sps:$4 sm:$0xff]   ;;  %v2449_v63 = vld [vmem:[#allocation5 + $0x1e0] ss:$16 sps:$4 sm:$0xff]   ;;  %v2450_v0 = vld [vmem:[#allocation5 + $0x1e8] ss:$16 sps:$4 sm:$0xff]  }
  0xa6   : > { %1003 = vmatpush1.bf16.msra.mxu0 %v2389_v22  ;;  %1196 = vmatpush1.bf16.msra.mxu1 %v2390_v23  ;;  %v2451_v1 = vld [vmem:[%s3016_s7] ss:$8 sps:$4 sm:$0xff]   ;;  %v2454_v2 = vld [vmem:[%s3016_s7 + $0x14] ss:$8 sps:$4 sm:$0xff]   ;;  %v2456_v3 = vld [vmem:[%s3016_s7 + $0x10] ss:$8 sps:$4 sm:$0xff]  }
  0xa7   : > { %1004 = vmatprep.subr.bf16.mxu0 %v2391_v24  ;;  %1197 = vmatprep.subr.bf16.mxu1 %v2393_v25  ;;  %v2457_v4 = vld [vmem:[%s3016_s7 + $0x24] ss:$8 sps:$4 sm:$0xff]   ;;  %v2459_v5 = vld [vmem:[%s3016_s7 + $0x20] ss:$8 sps:$4 sm:$0xff]   ;;  %v2460_v6 = vld [vmem:[%s3016_s7 + $0x34] ss:$8 sps:$4 sm:$0xff]  }
  0xa8   : > { %v2462_v7 = vld [vmem:[%s3016_s7 + $0x30] ss:$8 sps:$4 sm:$0xff]   ;;  %v2463_v8 = vld [vmem:[%s3016_s7 + $0x44] ss:$8 sps:$4 sm:$0xff]   ;;  %v2465_v9 = vld [vmem:[%s3016_s7 + $0x40] ss:$8 sps:$4 sm:$0xff]  }
  0xa9   : > { %v2466_v10 = vld [vmem:[%s3016_s7 + $0x54] ss:$8 sps:$4 sm:$0xff]   ;;  %v2468_v11 = vld [vmem:[%s3016_s7 + $0x50] ss:$8 sps:$4 sm:$0xff]   ;;  %v2469_v12 = vld [vmem:[%s3016_s7 + $0x64] ss:$8 sps:$4 sm:$0xff]  }
  0xaa   : > { %1005 = vmatpush1.bf16.msra.mxu0 %v2395_v26  ;;  %1198 = vmatpush1.bf16.msra.mxu1 %v2396_v27  ;;  %v2471_v13 = vld [vmem:[%s3016_s7 + $0x60] ss:$8 sps:$4 sm:$0xff]   ;;  %v2472_v14 = vld [vmem:[%s3016_s7 + $0x74] ss:$8 sps:$4 sm:$0xff]   ;;  %v2474_v15 = vld [vmem:[%s3016_s7 + $0x70] ss:$8 sps:$4 sm:$0xff]  }
  0xab   : > { %1006 = vmatprep.subr.bf16.mxu0 %v2397_v28  ;;  %1199 = vmatprep.subr.bf16.mxu1 %v2399_v29  ;;  %v2475_v16 = vld [vmem:[%s3016_s7 + $0x84] ss:$8 sps:$4 sm:$0xff]   ;;  %v2477_v17 = vld [vmem:[%s3016_s7 + $0x80] ss:$8 sps:$4 sm:$0xff]   ;;  %v2478_v18 = vld [vmem:[%s3016_s7 + $0x94] ss:$8 sps:$4 sm:$0xff]  }
  0xac   : > { %v2480_v19 = vld [vmem:[%s3016_s7 + $0x90] ss:$8 sps:$4 sm:$0xff]   ;;  %v2481_v20 = vld [vmem:[%s3016_s7 + $0xa4] ss:$8 sps:$4 sm:$0xff]   ;;  %v2483_v21 = vld [vmem:[%s3016_s7 + $0xa0] ss:$8 sps:$4 sm:$0xff]  }
  0xad   : > { %v2484_v22 = vld [vmem:[%s3016_s7 + $0xb4] ss:$8 sps:$4 sm:$0xff]   ;;  %v2486_v23 = vld [vmem:[%s3016_s7 + $0xb0] ss:$8 sps:$4 sm:$0xff]   ;;  %v2487_v24 = vld [vmem:[%s3016_s7 + $0xc4] ss:$8 sps:$4 sm:$0xff]  }
  0xae   : > { %1007 = vmatpush1.bf16.msra.mxu0 %v2401_v30  ;;  %1200 = vmatpush1.bf16.msra.mxu1 %v2402_v31  ;;  %v2489_v25 = vld [vmem:[%s3016_s7 + $0xc0] ss:$8 sps:$4 sm:$0xff]   ;;  %v2490_v26 = vld [vmem:[%s3016_s7 + $0xd4] ss:$8 sps:$4 sm:$0xff]   ;;  %v2492_v27 = vld [vmem:[%s3016_s7 + $0xd0] ss:$8 sps:$4 sm:$0xff]  }
  0xaf   : > { %1008 = vmatprep.subr.bf16.mxu0 %v2403_v32  ;;  %1201 = vmatprep.subr.bf16.mxu1 %v2405_v33  ;;  %v2493_v28 = vld [vmem:[%s3016_s7 + $0xe4] ss:$8 sps:$4 sm:$0xff]   ;;  %v2495_v29 = vld [vmem:[%s3016_s7 + $0xe0] ss:$8 sps:$4 sm:$0xff]   ;;  %v2496_v30 = vld [vmem:[%s3016_s7 + $0xf4] ss:$8 sps:$4 sm:$0xff]  }
  0xb0   : > { %v2498_v31 = vld [vmem:[%s3016_s7 + $0xf0] ss:$8 sps:$4 sm:$0xff]   ;;  %v384_v32 = vld [vmem:[%s3027_s29] sm:$0xff]  ;;  %s3074_s18 = scalar_lea.vmem [#allocation8], %s1993_s30  ;;  %s3375_s11 = sld [smem:[#allocation13_spill]] }
  0xb1   : > { %v386_v33 = vld [vmem:[%s3027_s29 + $0x10] sm:$0xff]  ;;  %s3376_s19 = sld [smem:[#allocation14_spill]]  ;;  %s1845_s10 = sshll.u32 %s3074_s18, 4  ;;  %s3264_s10 = int_to_ptr.vmem [resolvable:$true] %s1845_s10 }
  0xb2   : > { %1009 = vmatpush1.bf16.msra.mxu0 %v2407_v34  ;;  %1202 = vmatpush1.bf16.msra.mxu1 %v2408_v35  ;;  %v385_v34 = vld [vmem:[%s3027_s29 + $0x8] sm:$0xff]  ;;  %v387_v35 = vld [vmem:[%s3027_s29 + $0x18] sm:$0xff]  ;;  %s3377_s28 = sld [smem:[#allocation21_spill]]  ;;  %s1827_s5 = scalar_lea.sflag [#allocation4], %s3013_s4 }
  0xb3   : > { %1010 = vmatprep.subr.bf16.mxu0 %v2409_v36  ;;  %1203 = vmatprep.subr.bf16.mxu1 %v2411_v37  ;;  %s2587_s6 = scalar_lea.vmem %s3264_s10, 8192  ;;  %p3378_p8 = scmp.ne.s32.totalorder %s3361_s25, 0 }
  0xb4   : > { %p2588_p5 = scmp.ne.s32.totalorder %s3264_s10, %s2587_s6  ;;  %s2728_s7 = smov [#allocation8]  }
  0xb5   : > { %s2591_s20 = sshll.u32 %s2728_s7, 4  ;;  %s2592_s20 = int_to_ptr.vmem [resolvable:$false] %s2591_s20 }
  0xb6   : > { %1011 = vmatpush1.bf16.msra.mxu0 %v2413_v38  ;;  %1204 = vmatpush1.bf16.msra.mxu1 %v2414_v39  ;;  %v388_v38 = vld [vmem:[%s3027_s29 + $0x20] sm:$0xff]  ;;  %v390_v39 = vld [vmem:[%s3027_s29 + $0x30] sm:$0xff]  ;;  %s2228_s26 = sshll.u32 %s3375_s11, 7  ;;  %p2589_p4 = pnand %p2588_p5, %p3378_p8 }
  0xb7   : > { %1012 = vmatprep.subr.bf16.mxu0 %v2415_v40  ;;  %1205 = vmatprep.subr.bf16.mxu1 %v2417_v41  ;;  %s2157_s0 = sshll.u32 %s3376_s19, 8  ;;  %s2593_s8 = scalar_lea.vmem %s2592_s20, 16384 }
  0xb8   : > { %s1842_s24 = sadd.s32 %s2228_s26, %s2157_s0  ;;  %p2590_p7 = pneg %p2589_p4 }
  0xb9   : > { %s2158_s9 = sshll.u32 %s1842_s24, 6  ;;  %p2594_p9 = scmp.lt.s32.totalorder %s3264_s10, %s2592_s20 }
  0xba   : > { %1013 = vmatpush1.bf16.msra.mxu0 %v2419_v42  ;;  %1206 = vmatpush1.bf16.msra.mxu1 %v2420_v43  ;;  %s3262_s27 = scalar_lea.hbm %s3377_s28, %s2158_s9  ;;  %p2595_p3 = scmp.lt.s32.totalorder %s2593_s8, %s2587_s6 }
  0xbb   : > { %1014 = vmatprep.subr.bf16.mxu0 %v2421_v44  ;;  %1207 = vmatprep.subr.bf16.mxu1 %v2423_v45  ;;  %v389_v44 = vld [vmem:[%s3027_s29 + $0x28] sm:$0xff]  ;;  %v391_v45 = vld [vmem:[%s3027_s29 + $0x38] sm:$0xff] }
  0xbc   : > { %p2596_p6 = por %p2595_p3, %p2594_p9 }
  0xbe   : > { %1015 = vmatpush1.bf16.msra.mxu0 %v2425_v46  ;;  %1208 = vmatpush1.bf16.msra.mxu1 %v2426_v47  ;;  %p2597_p12 = pnand %p2596_p6, %p2590_p7 }
  0xbf   : > { %1016 = vmatprep.subr.bf16.mxu0 %v2427_v49  ;;  %1209 = vmatprep.subr.bf16.mxu1 %v2429_v50 }
  0xc2   : > { %1017 = vmatpush1.bf16.msra.mxu0 %v2431_v51  ;;  %1210 = vmatpush1.bf16.msra.mxu1 %v2432_v52 }
  0xc3   : > { %1018 = vmatprep.subr.bf16.mxu0 %v2433_v53  ;;  %1211 = vmatprep.subr.bf16.mxu1 %v2435_v54 }
  0xc6   : > { %1019 = vmatpush1.bf16.msra.mxu0 %v2437_v55  ;;  %1212 = vmatpush1.bf16.msra.mxu1 %v2438_v56 }
  0xc7   : > { %1020 = vmatprep.subr.bf16.mxu0 %v2439_v57  ;;  %1213 = vmatprep.subr.bf16.mxu1 %v2441_v58 }
  0xca   : > { %1021 = vmatpush1.bf16.msra.mxu0 %v2443_v59  ;;  %1214 = vmatpush1.bf16.msra.mxu1 %v2444_v60  ;;  %v392_v60 = vld [vmem:[%s3027_s29 + $0x40] sm:$0xff] }
  0xcb   : > { %1022 = vmatprep.subr.bf16.mxu0 %v2445_v61  ;;  %1215 = vmatprep.subr.bf16.mxu1 %v2447_v62  ;;  %v394_v61 = vld [vmem:[%s3027_s29 + $0x50] sm:$0xff]  ;;  %v393_v62 = vld [vmem:[%s3027_s29 + $0x48] sm:$0xff] }
  0xce   : > { %1023 = vmatpush1.bf16.msra.mxu0 %v2449_v63  ;;  %1216 = vmatpush1.bf16.msra.mxu1 %v2450_v0  ;;  %v395_v63 = vld [vmem:[%s3027_s29 + $0x58] sm:$0xff] }
  0xd1   : > { %1025 = vmatmul.mubr.bf16.vlgmr.msra.gmra.mrb[0].mxu0 %v2451_v1  ;;  %1218 = vmatmul.mubr.bf16.vlgmr.msra.gmra.mrb[0].mxu1 %v2451_v1 }
  0xd2   : > { %1034 = vmatprep.mubr.bf16.mxu0 %v2454_v2  ;;  %1227 = vmatprep.mubr.bf16.mxu1 %v2454_v2  ;;  %v396_v2 = vld [vmem:[%s3027_s29 + $0x60] sm:$0xff] }
  0xd9   : > { %1035 = vmatmul.mubr.bf16.gmra.mrb[4].mxu0 %v2456_v3  ;;  %1228 = vmatmul.mubr.bf16.gmra.mrb[4].mxu1 %v2456_v3  ;;  %v398_v3 = vld [vmem:[%s3027_s29 + $0x70] sm:$0xff] }
  0xda   : > { %1044 = vmatprep.mubr.bf16.mxu0 %v2457_v4  ;;  %1237 = vmatprep.mubr.bf16.mxu1 %v2457_v4 }
  0xe1   : > { %1045 = vmatmul.mubr.bf16.gmra.mrb[8].mxu0 %v2459_v5  ;;  %1238 = vmatmul.mubr.bf16.gmra.mrb[8].mxu1 %v2459_v5 }
  0xe2   : > { %1054 = vmatprep.mubr.bf16.mxu0 %v2460_v6  ;;  %1247 = vmatprep.mubr.bf16.mxu1 %v2460_v6 }
  0xe9   : > { %1055 = vmatmul.mubr.bf16.gmra.mrb[12].mxu0 %v2462_v7  ;;  %1248 = vmatmul.mubr.bf16.gmra.mrb[12].mxu1 %v2462_v7 }
  0xea   : > { %1064 = vmatprep.mubr.bf16.mxu0 %v2463_v8  ;;  %1257 = vmatprep.mubr.bf16.mxu1 %v2463_v8  ;;  %v397_v8 = vld [vmem:[%s3027_s29 + $0x68] sm:$0xff] }
  0xf1   : > { %1065 = vmatmul.mubr.bf16.gmra.mrb[16].mxu0 %v2465_v9  ;;  %1258 = vmatmul.mubr.bf16.gmra.mrb[16].mxu1 %v2465_v9  ;;  %v399_v9 = vld [vmem:[%s3027_s29 + $0x78] sm:$0xff] }
  0xf2   : > { %1074 = vmatprep.mubr.bf16.mxu0 %v2466_v10  ;;  %1267 = vmatprep.mubr.bf16.mxu1 %v2466_v10 }
  0xf9   : > { %1075 = vmatmul.mubr.bf16.gmra.mrb[20].mxu0 %v2468_v11  ;;  %1268 = vmatmul.mubr.bf16.gmra.mrb[20].mxu1 %v2468_v11 }
  0xfa   : > { %1084 = vmatprep.mubr.bf16.mxu0 %v2469_v12  ;;  %1277 = vmatprep.mubr.bf16.mxu1 %v2469_v12 }
 0x101   : > { %1085 = vmatmul.mubr.bf16.gmra.mrb[24].mxu0 %v2471_v13  ;;  %1278 = vmatmul.mubr.bf16.gmra.mrb[24].mxu1 %v2471_v13 }
 0x102   : > { %1094 = vmatprep.mubr.bf16.mxu0 %v2472_v14  ;;  %1287 = vmatprep.mubr.bf16.mxu1 %v2472_v14 }
 0x109   : > { %1095 = vmatmul.mubr.bf16.gmra.mrb[28].mxu0 %v2474_v15  ;;  %1288 = vmatmul.mubr.bf16.gmra.mrb[28].mxu1 %v2474_v15 }
 0x10a   : > { %1104 = vmatprep.mubr.bf16.mxu0 %v2475_v16  ;;  %1297 = vmatprep.mubr.bf16.mxu1 %v2475_v16 }
 0x111   : > { %1105 = vmatmul.mubr.bf16.gmra.mrb[32].mxu0 %v2477_v17  ;;  %1298 = vmatmul.mubr.bf16.gmra.mrb[32].mxu1 %v2477_v17 }
 0x112   : > { %1114 = vmatprep.mubr.bf16.mxu0 %v2478_v18  ;;  %1307 = vmatprep.mubr.bf16.mxu1 %v2478_v18 }
 0x119   : > { %1115 = vmatmul.mubr.bf16.gmra.mrb[36].mxu0 %v2480_v19  ;;  %1308 = vmatmul.mubr.bf16.gmra.mrb[36].mxu1 %v2480_v19 }
 0x11a   : > { %1124 = vmatprep.mubr.bf16.mxu0 %v2481_v20  ;;  %1317 = vmatprep.mubr.bf16.mxu1 %v2481_v20 }
 0x121   : > { %1125 = vmatmul.mubr.bf16.gmra.mrb[40].mxu0 %v2483_v21  ;;  %1318 = vmatmul.mubr.bf16.gmra.mrb[40].mxu1 %v2483_v21 }
 0x122   : > { %1134 = vmatprep.mubr.bf16.mxu0 %v2484_v22  ;;  %1327 = vmatprep.mubr.bf16.mxu1 %v2484_v22 }
 0x129   : > { %1135 = vmatmul.mubr.bf16.gmra.mrb[44].mxu0 %v2486_v23  ;;  %1328 = vmatmul.mubr.bf16.gmra.mrb[44].mxu1 %v2486_v23 }
 0x12a   : > { %1144 = vmatprep.mubr.bf16.mxu0 %v2487_v24  ;;  %1337 = vmatprep.mubr.bf16.mxu1 %v2487_v24  ;;  %v400_v24 = vld [vmem:[%s3027_s29 + $0x80] sm:$0xff] }
 0x131   : > { %1145 = vmatmul.mubr.bf16.gmra.mrb[48].mxu0 %v2489_v25  ;;  %1338 = vmatmul.mubr.bf16.gmra.mrb[48].mxu1 %v2489_v25  ;;  %v402_v25 = vld [vmem:[%s3027_s29 + $0x90] sm:$0xff] }
 0x132   : > { %1154 = vmatprep.mubr.bf16.mxu0 %v2490_v26  ;;  %1347 = vmatprep.mubr.bf16.mxu1 %v2490_v26  ;;  %v401_v26 = vld [vmem:[%s3027_s29 + $0x88] sm:$0xff] }
 0x139   : > { %1155 = vmatmul.mubr.bf16.gmra.mrb[52].mxu0 %v2492_v27  ;;  %1348 = vmatmul.mubr.bf16.gmra.mrb[52].mxu1 %v2492_v27  ;;  %v403_v27 = vld [vmem:[%s3027_s29 + $0x98] sm:$0xff] }
 0x13a   : > { %1164 = vmatprep.mubr.bf16.mxu0 %v2493_v28  ;;  %1357 = vmatprep.mubr.bf16.mxu1 %v2493_v28 }
 0x141   : > { %1165 = vmatmul.mubr.bf16.gmra.mrb[56].mxu0 %v2495_v29  ;;  %1358 = vmatmul.mubr.bf16.gmra.mrb[56].mxu1 %v2495_v29 }
 0x142   : > { %1174 = vmatprep.mubr.bf16.mxu0 %v2496_v30  ;;  %1367 = vmatprep.mubr.bf16.mxu1 %v2496_v30  ;;  %v404_v30 = vld [vmem:[%s3027_s29 + $0xa0] sm:$0xff] }
 0x149   : > { %1175 = vmatmul.mubr.bf16.gmra.mrb[60].mxu0 %v2498_v31  ;;  %1368 = vmatmul.mubr.bf16.gmra.mrb[60].mxu1 %v2498_v31  ;;  %v406_v31 = vld [vmem:[%s3027_s29 + $0xb0] sm:$0xff] }
 0x1a4   : > { %v1026_v36 = vpop.f32.mrb[0].mxu0  ;;  %v1219_v37 = vpop.f32.mrb[0].mxu1 }
 0x1a5   : > { %v1027_v40 = vadd.f32 %v1026_v36, %v384_v32  ;;  %v1220_v41 = vadd.f32 %v1219_v37, %v386_v33  ;;  %v1028_v42 = vpop.f32.mrb[1].mxu0  ;;  %v1221_v43 = vpop.f32.mrb[1].mxu1  ;;  %v405_v36 = vld [vmem:[%s3027_s29 + $0xa8] sm:$0xff]  ;;  %v407_v37 = vld [vmem:[%s3027_s29 + $0xb8] sm:$0xff] }
 0x1a6   : > { %v1029_v46 = vadd.f32 %v1028_v42, %v385_v34  ;;  %v1222_v47 = vadd.f32 %v1221_v43, %v387_v35  ;;  %v1030_v48 = vpop.f32.mrb[2].mxu0  ;;  %v1223_v49 = vpop.f32.mrb[2].mxu1 }
 0x1a7   : > { %v1031_v50 = vadd.f32 %v1030_v48, %v388_v38  ;;  %v1224_v51 = vadd.f32 %v1223_v49, %v390_v39  ;;  %v1032_v52 = vpop.f32.mrb[3].mxu0  ;;  %v1225_v53 = vpop.f32.mrb[3].mxu1 }
 0x1a8   : > { %v2164_v54 = vpack.c.bf16 %v1029_v46, %v1027_v40  ;;  %v2165_v55 = vpack.c.bf16 %v1222_v47, %v1220_v41  ;;  %v1033_v56 = vadd.f32 %v1032_v52, %v389_v44  ;;  %v1226_v57 = vadd.f32 %v1225_v53, %v391_v45  ;;  %v408_v52 = vld [vmem:[%s3027_s29 + $0xc0] sm:$0xff]  ;;  %v410_v53 = vld [vmem:[%s3027_s29 + $0xd0] sm:$0xff] }
 0x1aa   : > { %1762 = vst [vmem:[%s3074_s18] sm:$0xff] %v2164_v54  ;;  %1763 = vst [vmem:[%s3074_s18 + $0x8] sm:$0xff] %v2165_v55  ;;  %v2166_v58 = vpack.c.bf16 %v1033_v56, %v1031_v50  ;;  %v2167_v59 = vpack.c.bf16 %v1226_v57, %v1224_v51  ;;  %v409_v54 = vld [vmem:[%s3027_s29 + $0xc8] sm:$0xff]  ;;  %v411_v55 = vld [vmem:[%s3027_s29 + $0xd8] sm:$0xff] }
 0x1ac   : > { %1764 = vst [vmem:[%s3074_s18 + $0x10] sm:$0xff] %v2166_v58  ;;  %1765 = vst [vmem:[%s3074_s18 + $0x18] sm:$0xff] %v2167_v59  ;;  %v1036_v0 = vpop.f32.mrb[4].mxu0  ;;  %v1229_v1 = vpop.f32.mrb[4].mxu1  ;;  %v412_v58 = vld [vmem:[%s3027_s29 + $0xe0] sm:$0xff]  ;;  %v414_v59 = vld [vmem:[%s3027_s29 + $0xf0] sm:$0xff] }
 0x1ad   : > { %v1037_v4 = vadd.f32 %v1036_v0, %v392_v60  ;;  %v1230_v5 = vadd.f32 %v1229_v1, %v394_v61  ;;  %v1038_v6 = vpop.f32.mrb[5].mxu0  ;;  %v1231_v7 = vpop.f32.mrb[5].mxu1  ;;  %v413_v0 = vld [vmem:[%s3027_s29 + $0xe8] sm:$0xff]  ;;  %v415_v1 = vld [vmem:[%s3027_s29 + $0xf8] sm:$0xff] }
 0x1ae   : > { %v1039_v10 = vadd.f32 %v1038_v6, %v393_v62  ;;  %v1232_v11 = vadd.f32 %v1231_v7, %v395_v63  ;;  %v1040_v12 = vpop.f32.mrb[6].mxu0  ;;  %v1233_v13 = vpop.f32.mrb[6].mxu1 }
 0x1af   : > { %v1041_v14 = vadd.f32 %v1040_v12, %v396_v2  ;;  %v1234_v15 = vadd.f32 %v1233_v13, %v398_v3  ;;  %v1042_v16 = vpop.f32.mrb[7].mxu0  ;;  %v1235_v17 = vpop.f32.mrb[7].mxu1 }
 0x1b0   : > { %v2168_v18 = vpack.c.bf16 %v1039_v10, %v1037_v4  ;;  %v2169_v19 = vpack.c.bf16 %v1232_v11, %v1230_v5  ;;  %v1043_v20 = vadd.f32 %v1042_v16, %v397_v8  ;;  %v1236_v21 = vadd.f32 %v1235_v17, %v399_v9  ;;  %v416_v16 = vld [vmem:[%s3027_s29 + $0x100] sm:$0xff]  ;;  %v418_v17 = vld [vmem:[%s3027_s29 + $0x110] sm:$0xff] }
 0x1b2   : > { %1766 = vst [vmem:[%s3074_s18 + $0x20] sm:$0xff] %v2168_v18  ;;  %1767 = vst [vmem:[%s3074_s18 + $0x28] sm:$0xff] %v2169_v19  ;;  %v2170_v22 = vpack.c.bf16 %v1043_v20, %v1041_v14  ;;  %v2171_v23 = vpack.c.bf16 %v1236_v21, %v1234_v15  ;;  %v417_v18 = vld [vmem:[%s3027_s29 + $0x108] sm:$0xff]  ;;  %v419_v19 = vld [vmem:[%s3027_s29 + $0x118] sm:$0xff] }
 0x1b4   : > { %1768 = vst [vmem:[%s3074_s18 + $0x30] sm:$0xff] %v2170_v22  ;;  %1769 = vst [vmem:[%s3074_s18 + $0x38] sm:$0xff] %v2171_v23  ;;  %v1046_v28 = vpop.f32.mrb[8].mxu0  ;;  %v1239_v29 = vpop.f32.mrb[8].mxu1  ;;  %v420_v22 = vld [vmem:[%s3027_s29 + $0x120] sm:$0xff]  ;;  %v422_v23 = vld [vmem:[%s3027_s29 + $0x130] sm:$0xff] }
 0x1b5   : > { %v1047_v32 = vadd.f32 %v1046_v28, %v400_v24  ;;  %v1240_v33 = vadd.f32 %v1239_v29, %v402_v25  ;;  %v1048_v34 = vpop.f32.mrb[9].mxu0  ;;  %v1241_v35 = vpop.f32.mrb[9].mxu1  ;;  %v421_v28 = vld [vmem:[%s3027_s29 + $0x128] sm:$0xff]  ;;  %v423_v29 = vld [vmem:[%s3027_s29 + $0x138] sm:$0xff] }
 0x1b6   : > { %v1049_v38 = vadd.f32 %v1048_v34, %v401_v26  ;;  %v1242_v39 = vadd.f32 %v1241_v35, %v403_v27  ;;  %v1050_v40 = vpop.f32.mrb[10].mxu0  ;;  %v1243_v41 = vpop.f32.mrb[10].mxu1 }
 0x1b7   : > { %v1051_v42 = vadd.f32 %v1050_v40, %v404_v30  ;;  %v1244_v43 = vadd.f32 %v1243_v41, %v406_v31  ;;  %v1052_v44 = vpop.f32.mrb[11].mxu0  ;;  %v1245_v45 = vpop.f32.mrb[11].mxu1 }
 0x1b8   : > { %v2172_v46 = vpack.c.bf16 %v1049_v38, %v1047_v32  ;;  %v2173_v47 = vpack.c.bf16 %v1242_v39, %v1240_v33  ;;  %v1053_v48 = vadd.f32 %v1052_v44, %v405_v36  ;;  %v1246_v49 = vadd.f32 %v1245_v45, %v407_v37  ;;  %v424_v44 = vld [vmem:[%s3027_s29 + $0x140] sm:$0xff]  ;;  %v426_v45 = vld [vmem:[%s3027_s29 + $0x150] sm:$0xff] }
 0x1ba   : > { %1770 = vst [vmem:[%s3074_s18 + $0x40] sm:$0xff] %v2172_v46  ;;  %1771 = vst [vmem:[%s3074_s18 + $0x48] sm:$0xff] %v2173_v47  ;;  %v2174_v50 = vpack.c.bf16 %v1053_v48, %v1051_v42  ;;  %v2175_v51 = vpack.c.bf16 %v1246_v49, %v1244_v43  ;;  %v425_v46 = vld [vmem:[%s3027_s29 + $0x148] sm:$0xff]  ;;  %v427_v47 = vld [vmem:[%s3027_s29 + $0x158] sm:$0xff] }
 0x1bc   : > { %1772 = vst [vmem:[%s3074_s18 + $0x50] sm:$0xff] %v2174_v50  ;;  %1773 = vst [vmem:[%s3074_s18 + $0x58] sm:$0xff] %v2175_v51  ;;  %v1056_v56 = vpop.f32.mrb[12].mxu0  ;;  %v1249_v57 = vpop.f32.mrb[12].mxu1  ;;  %v428_v50 = vld [vmem:[%s3027_s29 + $0x160] sm:$0xff]  ;;  %v430_v51 = vld [vmem:[%s3027_s29 + $0x170] sm:$0xff] }
 0x1bd   : > { %v1057_v60 = vadd.f32 %v1056_v56, %v408_v52  ;;  %v1250_v61 = vadd.f32 %v1249_v57, %v410_v53  ;;  %v1058_v62 = vpop.f32.mrb[13].mxu0  ;;  %v1251_v63 = vpop.f32.mrb[13].mxu1  ;;  %v429_v56 = vld [vmem:[%s3027_s29 + $0x168] sm:$0xff]  ;;  %v431_v57 = vld [vmem:[%s3027_s29 + $0x178] sm:$0xff] }
 0x1be   : > { %v1059_v2 = vadd.f32 %v1058_v62, %v409_v54  ;;  %v1252_v3 = vadd.f32 %v1251_v63, %v411_v55  ;;  %v1060_v4 = vpop.f32.mrb[14].mxu0  ;;  %v1253_v5 = vpop.f32.mrb[14].mxu1 }
 0x1bf   : > { %v1061_v6 = vadd.f32 %v1060_v4, %v412_v58  ;;  %v1254_v7 = vadd.f32 %v1253_v5, %v414_v59  ;;  %v1062_v8 = vpop.f32.mrb[15].mxu0  ;;  %v1255_v9 = vpop.f32.mrb[15].mxu1 }
 0x1c0   : > { %v2176_v10 = vpack.c.bf16 %v1059_v2, %v1057_v60  ;;  %v2177_v11 = vpack.c.bf16 %v1252_v3, %v1250_v61  ;;  %v1063_v12 = vadd.f32 %v1062_v8, %v413_v0  ;;  %v1256_v13 = vadd.f32 %v1255_v9, %v415_v1  ;;  %v432_v8 = vld [vmem:[%s3027_s29 + $0x180] sm:$0xff]  ;;  %v434_v9 = vld [vmem:[%s3027_s29 + $0x190] sm:$0xff] }
 0x1c2   : > { %1774 = vst [vmem:[%s3074_s18 + $0x60] sm:$0xff] %v2176_v10  ;;  %1775 = vst [vmem:[%s3074_s18 + $0x68] sm:$0xff] %v2177_v11  ;;  %v2178_v14 = vpack.c.bf16 %v1063_v12, %v1061_v6  ;;  %v2179_v15 = vpack.c.bf16 %v1256_v13, %v1254_v7  ;;  %v433_v10 = vld [vmem:[%s3027_s29 + $0x188] sm:$0xff]  ;;  %v435_v11 = vld [vmem:[%s3027_s29 + $0x198] sm:$0xff] }
 0x1c4   : > { %1776 = vst [vmem:[%s3074_s18 + $0x70] sm:$0xff] %v2178_v14  ;;  %1777 = vst [vmem:[%s3074_s18 + $0x78] sm:$0xff] %v2179_v15  ;;  %v1066_v20 = vpop.f32.mrb[16].mxu0  ;;  %v1259_v21 = vpop.f32.mrb[16].mxu1  ;;  %v436_v14 = vld [vmem:[%s3027_s29 + $0x1a0] sm:$0xff]  ;;  %v438_v15 = vld [vmem:[%s3027_s29 + $0x1b0] sm:$0xff] }
 0x1c5   : > { %v1067_v24 = vadd.f32 %v1066_v20, %v416_v16  ;;  %v1260_v25 = vadd.f32 %v1259_v21, %v418_v17  ;;  %v1068_v26 = vpop.f32.mrb[17].mxu0  ;;  %v1261_v27 = vpop.f32.mrb[17].mxu1  ;;  %v437_v20 = vld [vmem:[%s3027_s29 + $0x1a8] sm:$0xff]  ;;  %v439_v21 = vld [vmem:[%s3027_s29 + $0x1b8] sm:$0xff] }
 0x1c6   : > { %v1069_v30 = vadd.f32 %v1068_v26, %v417_v18  ;;  %v1262_v31 = vadd.f32 %v1261_v27, %v419_v19  ;;  %v1070_v32 = vpop.f32.mrb[18].mxu0  ;;  %v1263_v33 = vpop.f32.mrb[18].mxu1 }
 0x1c7   : > { %v1071_v34 = vadd.f32 %v1070_v32, %v420_v22  ;;  %v1264_v35 = vadd.f32 %v1263_v33, %v422_v23  ;;  %v1072_v36 = vpop.f32.mrb[19].mxu0  ;;  %v1265_v37 = vpop.f32.mrb[19].mxu1 }
 0x1c8   : > { %v2180_v38 = vpack.c.bf16 %v1069_v30, %v1067_v24  ;;  %v2181_v39 = vpack.c.bf16 %v1262_v31, %v1260_v25  ;;  %v1073_v40 = vadd.f32 %v1072_v36, %v421_v28  ;;  %v1266_v41 = vadd.f32 %v1265_v37, %v423_v29  ;;  %v440_v36 = vld [vmem:[%s3027_s29 + $0x1c0] sm:$0xff]  ;;  %v442_v37 = vld [vmem:[%s3027_s29 + $0x1d0] sm:$0xff] }
 0x1ca   : > { %1778 = vst [vmem:[%s3074_s18 + $0x80] sm:$0xff] %v2180_v38  ;;  %1779 = vst [vmem:[%s3074_s18 + $0x88] sm:$0xff] %v2181_v39  ;;  %v2182_v42 = vpack.c.bf16 %v1073_v40, %v1071_v34  ;;  %v2183_v43 = vpack.c.bf16 %v1266_v41, %v1264_v35  ;;  %v441_v38 = vld [vmem:[%s3027_s29 + $0x1c8] sm:$0xff]  ;;  %v443_v39 = vld [vmem:[%s3027_s29 + $0x1d8] sm:$0xff] }
 0x1cc   : > { %1780 = vst [vmem:[%s3074_s18 + $0x90] sm:$0xff] %v2182_v42  ;;  %1781 = vst [vmem:[%s3074_s18 + $0x98] sm:$0xff] %v2183_v43  ;;  %v1076_v48 = vpop.f32.mrb[20].mxu0  ;;  %v1269_v49 = vpop.f32.mrb[20].mxu1  ;;  %v444_v42 = vld [vmem:[%s3027_s29 + $0x1e0] sm:$0xff]  ;;  %v446_v43 = vld [vmem:[%s3027_s29 + $0x1f0] sm:$0xff] }
 0x1cd   : > { %v1077_v52 = vadd.f32 %v1076_v48, %v424_v44  ;;  %v1270_v53 = vadd.f32 %v1269_v49, %v426_v45  ;;  %v1078_v54 = vpop.f32.mrb[21].mxu0  ;;  %v1271_v55 = vpop.f32.mrb[21].mxu1  ;;  %v445_v48 = vld [vmem:[%s3027_s29 + $0x1e8] sm:$0xff]  ;;  %v447_v49 = vld [vmem:[%s3027_s29 + $0x1f8] sm:$0xff] }
 0x1ce   : > { %v1079_v58 = vadd.f32 %v1078_v54, %v425_v46  ;;  %v1272_v59 = vadd.f32 %v1271_v55, %v427_v47  ;;  %v1080_v60 = vpop.f32.mrb[22].mxu0  ;;  %v1273_v61 = vpop.f32.mrb[22].mxu1 }
 0x1cf   : > { %v1081_v62 = vadd.f32 %v1080_v60, %v428_v50  ;;  %v1274_v63 = vadd.f32 %v1273_v61, %v430_v51  ;;  %v1082_v0 = vpop.f32.mrb[23].mxu0  ;;  %v1275_v1 = vpop.f32.mrb[23].mxu1 }
 0x1d0   : > { %v2184_v2 = vpack.c.bf16 %v1079_v58, %v1077_v52  ;;  %v2185_v3 = vpack.c.bf16 %v1272_v59, %v1270_v53  ;;  %v1083_v4 = vadd.f32 %v1082_v0, %v429_v56  ;;  %v1276_v5 = vadd.f32 %v1275_v1, %v431_v57  ;;  %v448_v0 = vld [vmem:[%s3027_s29 + $0x200] sm:$0xff]  ;;  %v450_v1 = vld [vmem:[%s3027_s29 + $0x210] sm:$0xff] }
 0x1d2   : > { %1782 = vst [vmem:[%s3074_s18 + $0xa0] sm:$0xff] %v2184_v2  ;;  %1783 = vst [vmem:[%s3074_s18 + $0xa8] sm:$0xff] %v2185_v3  ;;  %v2186_v6 = vpack.c.bf16 %v1083_v4, %v1081_v62  ;;  %v2187_v7 = vpack.c.bf16 %v1276_v5, %v1274_v63  ;;  %v449_v2 = vld [vmem:[%s3027_s29 + $0x208] sm:$0xff]  ;;  %v451_v3 = vld [vmem:[%s3027_s29 + $0x218] sm:$0xff] }
 0x1d4   : > { %1784 = vst [vmem:[%s3074_s18 + $0xb0] sm:$0xff] %v2186_v6  ;;  %1785 = vst [vmem:[%s3074_s18 + $0xb8] sm:$0xff] %v2187_v7  ;;  %v1086_v12 = vpop.f32.mrb[24].mxu0  ;;  %v1279_v13 = vpop.f32.mrb[24].mxu1  ;;  %v452_v6 = vld [vmem:[%s3027_s29 + $0x220] sm:$0xff]  ;;  %v454_v7 = vld [vmem:[%s3027_s29 + $0x230] sm:$0xff] }
 0x1d5   : > { %v1087_v16 = vadd.f32 %v1086_v12, %v432_v8  ;;  %v1280_v17 = vadd.f32 %v1279_v13, %v434_v9  ;;  %v1088_v18 = vpop.f32.mrb[25].mxu0  ;;  %v1281_v19 = vpop.f32.mrb[25].mxu1  ;;  %v453_v12 = vld [vmem:[%s3027_s29 + $0x228] sm:$0xff]  ;;  %v455_v13 = vld [vmem:[%s3027_s29 + $0x238] sm:$0xff] }
 0x1d6   : > { %v1089_v22 = vadd.f32 %v1088_v18, %v433_v10  ;;  %v1282_v23 = vadd.f32 %v1281_v19, %v435_v11  ;;  %v1090_v24 = vpop.f32.mrb[26].mxu0  ;;  %v1283_v25 = vpop.f32.mrb[26].mxu1 }
 0x1d7   : > { %v1091_v26 = vadd.f32 %v1090_v24, %v436_v14  ;;  %v1284_v27 = vadd.f32 %v1283_v25, %v438_v15  ;;  %v1092_v28 = vpop.f32.mrb[27].mxu0  ;;  %v1285_v29 = vpop.f32.mrb[27].mxu1 }
 0x1d8   : > { %v2188_v30 = vpack.c.bf16 %v1089_v22, %v1087_v16  ;;  %v2189_v31 = vpack.c.bf16 %v1282_v23, %v1280_v17  ;;  %v1093_v32 = vadd.f32 %v1092_v28, %v437_v20  ;;  %v1286_v33 = vadd.f32 %v1285_v29, %v439_v21  ;;  %v456_v28 = vld [vmem:[%s3027_s29 + $0x240] sm:$0xff]  ;;  %v458_v29 = vld [vmem:[%s3027_s29 + $0x250] sm:$0xff] }
 0x1da   : > { %1786 = vst [vmem:[%s3074_s18 + $0xc0] sm:$0xff] %v2188_v30  ;;  %1787 = vst [vmem:[%s3074_s18 + $0xc8] sm:$0xff] %v2189_v31  ;;  %v2190_v34 = vpack.c.bf16 %v1093_v32, %v1091_v26  ;;  %v2191_v35 = vpack.c.bf16 %v1286_v33, %v1284_v27  ;;  %v457_v30 = vld [vmem:[%s3027_s29 + $0x248] sm:$0xff]  ;;  %v459_v31 = vld [vmem:[%s3027_s29 + $0x258] sm:$0xff] }
 0x1dc   : > { %1788 = vst [vmem:[%s3074_s18 + $0xd0] sm:$0xff] %v2190_v34  ;;  %1789 = vst [vmem:[%s3074_s18 + $0xd8] sm:$0xff] %v2191_v35  ;;  %v1096_v40 = vpop.f32.mrb[28].mxu0  ;;  %v1289_v41 = vpop.f32.mrb[28].mxu1  ;;  %v460_v34 = vld [vmem:[%s3027_s29 + $0x260] sm:$0xff]  ;;  %v462_v35 = vld [vmem:[%s3027_s29 + $0x270] sm:$0xff] }
 0x1dd   : > { %v1097_v44 = vadd.f32 %v1096_v40, %v440_v36  ;;  %v1290_v45 = vadd.f32 %v1289_v41, %v442_v37  ;;  %v1098_v46 = vpop.f32.mrb[29].mxu0  ;;  %v1291_v47 = vpop.f32.mrb[29].mxu1  ;;  %v461_v40 = vld [vmem:[%s3027_s29 + $0x268] sm:$0xff]  ;;  %v463_v41 = vld [vmem:[%s3027_s29 + $0x278] sm:$0xff] }
 0x1de   : > { %v1099_v50 = vadd.f32 %v1098_v46, %v441_v38  ;;  %v1292_v51 = vadd.f32 %v1291_v47, %v443_v39  ;;  %v1100_v52 = vpop.f32.mrb[30].mxu0  ;;  %v1293_v53 = vpop.f32.mrb[30].mxu1 }
 0x1df   : > { %v1101_v54 = vadd.f32 %v1100_v52, %v444_v42  ;;  %v1294_v55 = vadd.f32 %v1293_v53, %v446_v43  ;;  %v1102_v56 = vpop.f32.mrb[31].mxu0  ;;  %v1295_v57 = vpop.f32.mrb[31].mxu1 }
 0x1e0   : > { %v2192_v58 = vpack.c.bf16 %v1099_v50, %v1097_v44  ;;  %v2193_v59 = vpack.c.bf16 %v1292_v51, %v1290_v45  ;;  %v1103_v60 = vadd.f32 %v1102_v56, %v445_v48  ;;  %v1296_v61 = vadd.f32 %v1295_v57, %v447_v49  ;;  %v464_v56 = vld [vmem:[%s3027_s29 + $0x280] sm:$0xff]  ;;  %v466_v57 = vld [vmem:[%s3027_s29 + $0x290] sm:$0xff] }
 0x1e2   : > { %1790 = vst [vmem:[%s3074_s18 + $0xe0] sm:$0xff] %v2192_v58  ;;  %1791 = vst [vmem:[%s3074_s18 + $0xe8] sm:$0xff] %v2193_v59  ;;  %v2194_v62 = vpack.c.bf16 %v1103_v60, %v1101_v54  ;;  %v2195_v63 = vpack.c.bf16 %v1296_v61, %v1294_v55  ;;  %v465_v58 = vld [vmem:[%s3027_s29 + $0x288] sm:$0xff]  ;;  %v467_v59 = vld [vmem:[%s3027_s29 + $0x298] sm:$0xff] }
 0x1e4   : > { %1792 = vst [vmem:[%s3074_s18 + $0xf0] sm:$0xff] %v2194_v62  ;;  %1793 = vst [vmem:[%s3074_s18 + $0xf8] sm:$0xff] %v2195_v63  ;;  %v1106_v4 = vpop.f32.mrb[32].mxu0  ;;  %v1299_v5 = vpop.f32.mrb[32].mxu1  ;;  %v468_v62 = vld [vmem:[%s3027_s29 + $0x2a0] sm:$0xff]  ;;  %v470_v63 = vld [vmem:[%s3027_s29 + $0x2b0] sm:$0xff] }
 0x1e5   : > { %v1107_v8 = vadd.f32 %v1106_v4, %v448_v0  ;;  %v1300_v9 = vadd.f32 %v1299_v5, %v450_v1  ;;  %v1108_v10 = vpop.f32.mrb[33].mxu0  ;;  %v1301_v11 = vpop.f32.mrb[33].mxu1  ;;  %v469_v4 = vld [vmem:[%s3027_s29 + $0x2a8] sm:$0xff]  ;;  %v471_v5 = vld [vmem:[%s3027_s29 + $0x2b8] sm:$0xff] }
 0x1e6   : > { %v1109_v14 = vadd.f32 %v1108_v10, %v449_v2  ;;  %v1302_v15 = vadd.f32 %v1301_v11, %v451_v3  ;;  %v1110_v16 = vpop.f32.mrb[34].mxu0  ;;  %v1303_v17 = vpop.f32.mrb[34].mxu1 }
 0x1e7   : > { %v1111_v18 = vadd.f32 %v1110_v16, %v452_v6  ;;  %v1304_v19 = vadd.f32 %v1303_v17, %v454_v7  ;;  %v1112_v20 = vpop.f32.mrb[35].mxu0  ;;  %v1305_v21 = vpop.f32.mrb[35].mxu1 }
 0x1e8   : > { %v2196_v22 = vpack.c.bf16 %v1109_v14, %v1107_v8  ;;  %v2197_v23 = vpack.c.bf16 %v1302_v15, %v1300_v9  ;;  %v1113_v24 = vadd.f32 %v1112_v20, %v453_v12  ;;  %v1306_v25 = vadd.f32 %v1305_v21, %v455_v13  ;;  %v472_v20 = vld [vmem:[%s3027_s29 + $0x2c0] sm:$0xff]  ;;  %v474_v21 = vld [vmem:[%s3027_s29 + $0x2d0] sm:$0xff] }
 0x1ea   : > { %1794 = vst [vmem:[%s3074_s18 + $0x100] sm:$0xff] %v2196_v22  ;;  %1795 = vst [vmem:[%s3074_s18 + $0x108] sm:$0xff] %v2197_v23  ;;  %v2198_v26 = vpack.c.bf16 %v1113_v24, %v1111_v18  ;;  %v2199_v27 = vpack.c.bf16 %v1306_v25, %v1304_v19  ;;  %v473_v22 = vld [vmem:[%s3027_s29 + $0x2c8] sm:$0xff]  ;;  %v475_v23 = vld [vmem:[%s3027_s29 + $0x2d8] sm:$0xff] }
 0x1ec   : > { %1796 = vst [vmem:[%s3074_s18 + $0x110] sm:$0xff] %v2198_v26  ;;  %1797 = vst [vmem:[%s3074_s18 + $0x118] sm:$0xff] %v2199_v27  ;;  %v1116_v32 = vpop.f32.mrb[36].mxu0  ;;  %v1309_v33 = vpop.f32.mrb[36].mxu1  ;;  %v476_v26 = vld [vmem:[%s3027_s29 + $0x2e0] sm:$0xff]  ;;  %v478_v27 = vld [vmem:[%s3027_s29 + $0x2f0] sm:$0xff] }
 0x1ed   : > { %v1117_v36 = vadd.f32 %v1116_v32, %v456_v28  ;;  %v1310_v37 = vadd.f32 %v1309_v33, %v458_v29  ;;  %v1118_v38 = vpop.f32.mrb[37].mxu0  ;;  %v1311_v39 = vpop.f32.mrb[37].mxu1  ;;  %v477_v32 = vld [vmem:[%s3027_s29 + $0x2e8] sm:$0xff]  ;;  %v479_v33 = vld [vmem:[%s3027_s29 + $0x2f8] sm:$0xff] }
 0x1ee   : > { %v1119_v42 = vadd.f32 %v1118_v38, %v457_v30  ;;  %v1312_v43 = vadd.f32 %v1311_v39, %v459_v31  ;;  %v1120_v44 = vpop.f32.mrb[38].mxu0  ;;  %v1313_v45 = vpop.f32.mrb[38].mxu1 }
 0x1ef   : > { %v1121_v46 = vadd.f32 %v1120_v44, %v460_v34  ;;  %v1314_v47 = vadd.f32 %v1313_v45, %v462_v35  ;;  %v1122_v48 = vpop.f32.mrb[39].mxu0  ;;  %v1315_v49 = vpop.f32.mrb[39].mxu1 }
 0x1f0   : > { %v2200_v50 = vpack.c.bf16 %v1119_v42, %v1117_v36  ;;  %v2201_v51 = vpack.c.bf16 %v1312_v43, %v1310_v37  ;;  %v1123_v52 = vadd.f32 %v1122_v48, %v461_v40  ;;  %v1316_v53 = vadd.f32 %v1315_v49, %v463_v41  ;;  %v480_v48 = vld [vmem:[%s3027_s29 + $0x300] sm:$0xff]  ;;  %v482_v49 = vld [vmem:[%s3027_s29 + $0x310] sm:$0xff] }
 0x1f2   : > { %1798 = vst [vmem:[%s3074_s18 + $0x120] sm:$0xff] %v2200_v50  ;;  %1799 = vst [vmem:[%s3074_s18 + $0x128] sm:$0xff] %v2201_v51  ;;  %v2202_v54 = vpack.c.bf16 %v1123_v52, %v1121_v46  ;;  %v2203_v55 = vpack.c.bf16 %v1316_v53, %v1314_v47  ;;  %v481_v50 = vld [vmem:[%s3027_s29 + $0x308] sm:$0xff]  ;;  %v483_v51 = vld [vmem:[%s3027_s29 + $0x318] sm:$0xff] }
 0x1f4   : > { %1800 = vst [vmem:[%s3074_s18 + $0x130] sm:$0xff] %v2202_v54  ;;  %1801 = vst [vmem:[%s3074_s18 + $0x138] sm:$0xff] %v2203_v55  ;;  %v1126_v60 = vpop.f32.mrb[40].mxu0  ;;  %v1319_v61 = vpop.f32.mrb[40].mxu1  ;;  %v484_v54 = vld [vmem:[%s3027_s29 + $0x320] sm:$0xff]  ;;  %v486_v55 = vld [vmem:[%s3027_s29 + $0x330] sm:$0xff] }
 0x1f5   : > { %v1127_v0 = vadd.f32 %v1126_v60, %v464_v56  ;;  %v1320_v1 = vadd.f32 %v1319_v61, %v466_v57  ;;  %v1128_v2 = vpop.f32.mrb[41].mxu0  ;;  %v1321_v3 = vpop.f32.mrb[41].mxu1  ;;  %v485_v60 = vld [vmem:[%s3027_s29 + $0x328] sm:$0xff]  ;;  %v487_v61 = vld [vmem:[%s3027_s29 + $0x338] sm:$0xff] }
 0x1f6   : > { %v1129_v6 = vadd.f32 %v1128_v2, %v465_v58  ;;  %v1322_v7 = vadd.f32 %v1321_v3, %v467_v59  ;;  %v1130_v8 = vpop.f32.mrb[42].mxu0  ;;  %v1323_v9 = vpop.f32.mrb[42].mxu1 }
 0x1f7   : > { %v1131_v10 = vadd.f32 %v1130_v8, %v468_v62  ;;  %v1324_v11 = vadd.f32 %v1323_v9, %v470_v63  ;;  %v1132_v12 = vpop.f32.mrb[43].mxu0  ;;  %v1325_v13 = vpop.f32.mrb[43].mxu1 }
 0x1f8   : > { %v2204_v14 = vpack.c.bf16 %v1129_v6, %v1127_v0  ;;  %v2205_v15 = vpack.c.bf16 %v1322_v7, %v1320_v1  ;;  %v1133_v16 = vadd.f32 %v1132_v12, %v469_v4  ;;  %v1326_v17 = vadd.f32 %v1325_v13, %v471_v5  ;;  %v488_v12 = vld [vmem:[%s3027_s29 + $0x340] sm:$0xff]  ;;  %v490_v13 = vld [vmem:[%s3027_s29 + $0x350] sm:$0xff] }
 0x1fa   : > { %1802 = vst [vmem:[%s3074_s18 + $0x140] sm:$0xff] %v2204_v14  ;;  %1803 = vst [vmem:[%s3074_s18 + $0x148] sm:$0xff] %v2205_v15  ;;  %v2206_v18 = vpack.c.bf16 %v1133_v16, %v1131_v10  ;;  %v2207_v19 = vpack.c.bf16 %v1326_v17, %v1324_v11  ;;  %v489_v14 = vld [vmem:[%s3027_s29 + $0x348] sm:$0xff]  ;;  %v491_v15 = vld [vmem:[%s3027_s29 + $0x358] sm:$0xff] }
 0x1fc   : > { %1804 = vst [vmem:[%s3074_s18 + $0x150] sm:$0xff] %v2206_v18  ;;  %1805 = vst [vmem:[%s3074_s18 + $0x158] sm:$0xff] %v2207_v19  ;;  %v1136_v24 = vpop.f32.mrb[44].mxu0  ;;  %v1329_v25 = vpop.f32.mrb[44].mxu1  ;;  %v492_v18 = vld [vmem:[%s3027_s29 + $0x360] sm:$0xff]  ;;  %v494_v19 = vld [vmem:[%s3027_s29 + $0x370] sm:$0xff] }
 0x1fd   : > { %v1137_v28 = vadd.f32 %v1136_v24, %v472_v20  ;;  %v1330_v29 = vadd.f32 %v1329_v25, %v474_v21  ;;  %v1138_v30 = vpop.f32.mrb[45].mxu0  ;;  %v1331_v31 = vpop.f32.mrb[45].mxu1  ;;  %v493_v24 = vld [vmem:[%s3027_s29 + $0x368] sm:$0xff]  ;;  %v495_v25 = vld [vmem:[%s3027_s29 + $0x378] sm:$0xff] }
 0x1fe   : > { %v1139_v34 = vadd.f32 %v1138_v30, %v473_v22  ;;  %v1332_v35 = vadd.f32 %v1331_v31, %v475_v23  ;;  %v1140_v36 = vpop.f32.mrb[46].mxu0  ;;  %v1333_v37 = vpop.f32.mrb[46].mxu1 }
 0x1ff   : > { %v1141_v38 = vadd.f32 %v1140_v36, %v476_v26  ;;  %v1334_v39 = vadd.f32 %v1333_v37, %v478_v27  ;;  %v1142_v40 = vpop.f32.mrb[47].mxu0  ;;  %v1335_v41 = vpop.f32.mrb[47].mxu1 }
 0x200   : > { %v2208_v42 = vpack.c.bf16 %v1139_v34, %v1137_v28  ;;  %v2209_v43 = vpack.c.bf16 %v1332_v35, %v1330_v29  ;;  %v1143_v44 = vadd.f32 %v1142_v40, %v477_v32  ;;  %v1336_v45 = vadd.f32 %v1335_v41, %v479_v33  ;;  %v496_v40 = vld [vmem:[%s3027_s29 + $0x380] sm:$0xff]  ;;  %v498_v41 = vld [vmem:[%s3027_s29 + $0x390] sm:$0xff] }
 0x202   : > { %1806 = vst [vmem:[%s3074_s18 + $0x160] sm:$0xff] %v2208_v42  ;;  %1807 = vst [vmem:[%s3074_s18 + $0x168] sm:$0xff] %v2209_v43  ;;  %v2210_v46 = vpack.c.bf16 %v1143_v44, %v1141_v38  ;;  %v2211_v47 = vpack.c.bf16 %v1336_v45, %v1334_v39  ;;  %v497_v42 = vld [vmem:[%s3027_s29 + $0x388] sm:$0xff]  ;;  %v499_v43 = vld [vmem:[%s3027_s29 + $0x398] sm:$0xff] }
 0x204   : > { %1808 = vst [vmem:[%s3074_s18 + $0x170] sm:$0xff] %v2210_v46  ;;  %1809 = vst [vmem:[%s3074_s18 + $0x178] sm:$0xff] %v2211_v47  ;;  %v1146_v52 = vpop.f32.mrb[48].mxu0  ;;  %v1339_v53 = vpop.f32.mrb[48].mxu1  ;;  %v500_v46 = vld [vmem:[%s3027_s29 + $0x3a0] sm:$0xff]  ;;  %v502_v47 = vld [vmem:[%s3027_s29 + $0x3b0] sm:$0xff] }
 0x205   : > { %v1147_v56 = vadd.f32 %v1146_v52, %v480_v48  ;;  %v1340_v57 = vadd.f32 %v1339_v53, %v482_v49  ;;  %v1148_v58 = vpop.f32.mrb[49].mxu0  ;;  %v1341_v59 = vpop.f32.mrb[49].mxu1  ;;  %v501_v52 = vld [vmem:[%s3027_s29 + $0x3a8] sm:$0xff]  ;;  %v503_v53 = vld [vmem:[%s3027_s29 + $0x3b8] sm:$0xff] }
 0x206   : > { %v1149_v62 = vadd.f32 %v1148_v58, %v481_v50  ;;  %v1342_v63 = vadd.f32 %v1341_v59, %v483_v51  ;;  %v1150_v0 = vpop.f32.mrb[50].mxu0  ;;  %v1343_v1 = vpop.f32.mrb[50].mxu1 }
 0x207   : > { %v1151_v2 = vadd.f32 %v1150_v0, %v484_v54  ;;  %v1344_v3 = vadd.f32 %v1343_v1, %v486_v55  ;;  %v1152_v4 = vpop.f32.mrb[51].mxu0  ;;  %v1345_v5 = vpop.f32.mrb[51].mxu1 }
 0x208   : > { %v2212_v6 = vpack.c.bf16 %v1149_v62, %v1147_v56  ;;  %v2213_v7 = vpack.c.bf16 %v1342_v63, %v1340_v57  ;;  %v1153_v8 = vadd.f32 %v1152_v4, %v485_v60  ;;  %v1346_v9 = vadd.f32 %v1345_v5, %v487_v61  ;;  %v504_v4 = vld [vmem:[%s3027_s29 + $0x3c0] sm:$0xff]  ;;  %v506_v5 = vld [vmem:[%s3027_s29 + $0x3d0] sm:$0xff] }
 0x20a   : > { %1810 = vst [vmem:[%s3074_s18 + $0x180] sm:$0xff] %v2212_v6  ;;  %1811 = vst [vmem:[%s3074_s18 + $0x188] sm:$0xff] %v2213_v7  ;;  %v2214_v10 = vpack.c.bf16 %v1153_v8, %v1151_v2  ;;  %v2215_v11 = vpack.c.bf16 %v1346_v9, %v1344_v3  ;;  %v505_v6 = vld [vmem:[%s3027_s29 + $0x3c8] sm:$0xff]  ;;  %v507_v7 = vld [vmem:[%s3027_s29 + $0x3d8] sm:$0xff] }
 0x20c   : > { %1812 = vst [vmem:[%s3074_s18 + $0x190] sm:$0xff] %v2214_v10  ;;  %1813 = vst [vmem:[%s3074_s18 + $0x198] sm:$0xff] %v2215_v11  ;;  %v1156_v16 = vpop.f32.mrb[52].mxu0  ;;  %v1349_v17 = vpop.f32.mrb[52].mxu1  ;;  %v508_v10 = vld [vmem:[%s3027_s29 + $0x3e0] sm:$0xff]  ;;  %v510_v11 = vld [vmem:[%s3027_s29 + $0x3f0] sm:$0xff] }
 0x20d   : > { %v1157_v20 = vadd.f32 %v1156_v16, %v488_v12  ;;  %v1350_v21 = vadd.f32 %v1349_v17, %v490_v13  ;;  %v1158_v22 = vpop.f32.mrb[53].mxu0  ;;  %v1351_v23 = vpop.f32.mrb[53].mxu1  ;;  %v509_v16 = vld [vmem:[%s3027_s29 + $0x3e8] sm:$0xff]  ;;  %v511_v17 = vld [vmem:[%s3027_s29 + $0x3f8] sm:$0xff] }
 0x20e   : > { %v1159_v26 = vadd.f32 %v1158_v22, %v489_v14  ;;  %v1352_v27 = vadd.f32 %v1351_v23, %v491_v15  ;;  %v1160_v28 = vpop.f32.mrb[54].mxu0  ;;  %v1353_v29 = vpop.f32.mrb[54].mxu1 }
 0x20f   : > { %v1161_v30 = vadd.f32 %v1160_v28, %v492_v18  ;;  %v1354_v31 = vadd.f32 %v1353_v29, %v494_v19  ;;  %v1162_v32 = vpop.f32.mrb[55].mxu0  ;;  %v1355_v33 = vpop.f32.mrb[55].mxu1 }
 0x210   : > { %v2216_v34 = vpack.c.bf16 %v1159_v26, %v1157_v20  ;;  %v2217_v35 = vpack.c.bf16 %v1352_v27, %v1350_v21  ;;  %v1163_v36 = vadd.f32 %v1162_v32, %v493_v24  ;;  %v1356_v37 = vadd.f32 %v1355_v33, %v495_v25 }
 0x212   : > { %1814 = vst [vmem:[%s3074_s18 + $0x1a0] sm:$0xff] %v2216_v34  ;;  %1815 = vst [vmem:[%s3074_s18 + $0x1a8] sm:$0xff] %v2217_v35  ;;  %v2218_v38 = vpack.c.bf16 %v1163_v36, %v1161_v30  ;;  %v2219_v39 = vpack.c.bf16 %v1356_v37, %v1354_v31 }
 0x214   : > { %1816 = vst [vmem:[%s3074_s18 + $0x1b0] sm:$0xff] %v2218_v38  ;;  %1817 = vst [vmem:[%s3074_s18 + $0x1b8] sm:$0xff] %v2219_v39  ;;  %v1166_v44 = vpop.f32.mrb[56].mxu0  ;;  %v1359_v45 = vpop.f32.mrb[56].mxu1 }
 0x215   : > { %v1167_v48 = vadd.f32 %v1166_v44, %v496_v40  ;;  %v1360_v49 = vadd.f32 %v1359_v45, %v498_v41  ;;  %v1168_v50 = vpop.f32.mrb[57].mxu0  ;;  %v1361_v51 = vpop.f32.mrb[57].mxu1 }
 0x216   : > { %v1169_v54 = vadd.f32 %v1168_v50, %v497_v42  ;;  %v1362_v55 = vadd.f32 %v1361_v51, %v499_v43  ;;  %v1170_v56 = vpop.f32.mrb[58].mxu0  ;;  %v1363_v57 = vpop.f32.mrb[58].mxu1 }
 0x217   : > { %v1171_v58 = vadd.f32 %v1170_v56, %v500_v46  ;;  %v1364_v59 = vadd.f32 %v1363_v57, %v502_v47  ;;  %v1172_v60 = vpop.f32.mrb[59].mxu0  ;;  %v1365_v61 = vpop.f32.mrb[59].mxu1 }
 0x218   : > { %v2220_v62 = vpack.c.bf16 %v1169_v54, %v1167_v48  ;;  %v2221_v63 = vpack.c.bf16 %v1362_v55, %v1360_v49  ;;  %v1173_v0 = vadd.f32 %v1172_v60, %v501_v52  ;;  %v1366_v1 = vadd.f32 %v1365_v61, %v503_v53 }
 0x21a   : > { %1818 = vst [vmem:[%s3074_s18 + $0x1c0] sm:$0xff] %v2220_v62  ;;  %1819 = vst [vmem:[%s3074_s18 + $0x1c8] sm:$0xff] %v2221_v63  ;;  %v2222_v2 = vpack.c.bf16 %v1173_v0, %v1171_v58  ;;  %v2223_v3 = vpack.c.bf16 %v1366_v1, %v1364_v59 }
 0x21c   : > { %1820 = vst [vmem:[%s3074_s18 + $0x1d0] sm:$0xff] %v2222_v2  ;;  %1821 = vst [vmem:[%s3074_s18 + $0x1d8] sm:$0xff] %v2223_v3  ;;  %v1176_v8 = vpop.f32.mrb[60].mxu0  ;;  %v1369_v9 = vpop.f32.mrb[60].mxu1 }
 0x21d   : > { %v1177_v12 = vadd.f32 %v1176_v8, %v504_v4  ;;  %v1370_v13 = vadd.f32 %v1369_v9, %v506_v5  ;;  %v1178_v14 = vpop.f32.mrb[61].mxu0  ;;  %v1371_v15 = vpop.f32.mrb[61].mxu1 }
 0x21e   : > { %v1179_v18 = vadd.f32 %v1178_v14, %v505_v6  ;;  %v1372_v19 = vadd.f32 %v1371_v15, %v507_v7  ;;  %v1180_v20 = vpop.f32.mrb[62].mxu0  ;;  %v1373_v21 = vpop.f32.mrb[62].mxu1 }
 0x21f   : > { %v1181_v22 = vadd.f32 %v1180_v20, %v508_v10  ;;  %v1374_v23 = vadd.f32 %v1373_v21, %v510_v11  ;;  %v1182_v24 = vpop.f32.mrb[63].mxu0  ;;  %v1375_v25 = vpop.f32.mrb[63].mxu1 }
 0x220   : > { %v2224_v26 = vpack.c.bf16 %v1179_v18, %v1177_v12  ;;  %v2225_v27 = vpack.c.bf16 %v1372_v19, %v1370_v13  ;;  %v1183_v28 = vadd.f32 %v1182_v24, %v509_v16  ;;  %v1376_v29 = vadd.f32 %v1375_v25, %v511_v17 }
 0x222   : > { %1822 = vst [vmem:[%s3074_s18 + $0x1e0] sm:$0xff] %v2224_v26  ;;  %1823 = vst [vmem:[%s3074_s18 + $0x1e8] sm:$0xff] %v2225_v27  ;;  %v2226_v30 = vpack.c.bf16 %v1183_v28, %v1181_v22  ;;  %v2227_v31 = vpack.c.bf16 %v1376_v29, %v1374_v23 }
 0x224   : > { %1824 = vst [vmem:[%s3074_s18 + $0x1f0] sm:$0xff] %v2226_v30  ;;  %1825 = vst [vmem:[%s3074_s18 + $0x1f8] sm:$0xff] %v2227_v31 }
 0x225   : > { %2600 = shalt.err (!%p2597_p12)
}
 0x226   : > { %s2601_s29 = scalar_lea.hbm %s3262_s27, 8192  ;;  %s2605_s11 = scalar_lea.hbm %s3377_s28, 32768 }
 0x227   : > { %p2602_p11 = scmp.ne.s32.totalorder %s3262_s27, %s2601_s29  ;;  %p2606_p0 = scmp.lt.u32.totalorder %s3262_s27, %s3377_s28 }
 0x228   : > { %p2607_p13 = scmp.lt.u32.totalorder %s2605_s11, %s2601_s29  ;;  %p2609_p5 = scmp.lt.u32.totalorder %s2601_s29, %s3262_s27 }
 0x229   : > { %p2603_p2 = pnand %p2602_p11, %p3378_p8 }
 0x22a   : > { %p2608_p1 = por %p2607_p13, %p2606_p0 }
 0x22b   : > { %p2604_p10 = pneg %p2603_p2 }
 0x22c   : > { %p2610_p4 = por %p2609_p5, %p2608_p1 }
 0x22e   : > { %p2611_p7 = pnand %p2610_p4, %p2604_p10 }
 0x230   : > { %2614 = shalt.err (!%p2611_p7)
}
 0x231   : > { %s2729_s0 = smov 256   ;;  %s2730_s24 = smov 16  }
 0x232   : > { %2237 = dma.vmem_to_hbm [thread:$0]  (%p3378_p8), %s3264_s10, 8192, %s3262_s27, %s1827_s5, %s2729_s0, %s2729_s0, %s2730_s24  }
 0x233 PF: > { %p2257_p9 = scmp.ge.s32.totalorder %s2717_s22, 2  ;;  %s1860_s9 = sand.u32 1, %s2689_s15  }
 0x234   : > { %p3379_p3 = scmp.ne.s32.totalorder %s3362_s12, 0  ;;  %s1861_s3 = scalar_lea.sflag [#allocation4], %s1860_s9 }
 0x236   : > { %p2251_p6 = pnand %p2257_p9, %p3379_p3 }
 0x238   : > { %2672 = dma.done.wait (!%p2251_p6), %s1861_s3, 8192  }
 0x239   : > { %2674 = vsyncadd (!%p2251_p6), %s1861_s3, 4294959104  ;;  %s20_s22 = sadd.s32 1, %s2717_s22   ;;  %s3380_s25 = sld [smem:[#allocation19_spill]] }
 0x23a   : > { %p17_p12 = scmp.ge.s32.totalorder %s20_s22, 6   ;;  %s3381_s18 = sld [smem:[#allocation15_spill]] }
 0x23b   : > { %s3382_s19 = sld [smem:[#allocation16_spill]]  ;;  %s3383_s20 = sld [smem:[#allocation17_spill]] }
 0x23c   : > { %s3384_s4 = sld [smem:[#allocation18_spill]]  ;;  %s3385_s12 = smov %s2681_s13 }
 0x23d   : > { %s3386_s13 = smov %s2685_s14  ;;  %s3387_s14 = smov %s2963_s21 }
 0x23e   : > { %s3388_s15 = smov %s2693_s16  ;;  %s3389_s16 = smov %s2697_s17 }
 0x23f   : > { %s3390_s17 = smov %s3380_s25  ;;  %19 = sbr.rel (!%p17_p12) target bundleno = 13 (0xd), region = 93 }
 0x242   : > { %s3391_s21 = smov %s3384_s4 }
 0x246   :  { %1866 = vsyncpa [#allocation3], 1 }
 0x247   :  { %1868 = vsyncpa [#allocation3 + $0x1], 1 }
 0x248   :  { %1869 = vsyncpa [#allocation6], 1 }
 0x249   :  { %1870 = vsyncpa [#allocation4], 1 }
 0x24a   :  { %1872 = vsyncpa [#allocation4 + $0x1], 1 }

</bundles_post_ra>
